<compile_context>
chip_gen: v7x
topology: tpu7x:2x2x1
jax: 0.10.0
libtpu: 0.0.40
codegen_flags: <defaults>
</compile_context>

<pallas_src>
import jax
import jax.numpy as jnp
import numpy as np
from jax.experimental import pallas as pl
from jax.experimental.pallas import tpu as pltpu

# ---------------- configuration (small, consistent with the module) ----------------
BATCH = 8                      # minibatch size
VOCAB = 50                     # anime_embedding_vocab
EMB = 16                       # anime_embedding_dim
HID = 32                       # lstm_hidden_dim
L = 10                         # num_past_animes == past_anime_length
RAT = 11                       # encoded_values_for_rating (lstm input = emb_dim + 11)
D_IN = EMB + RAT               # LSTM input feature dim
EPS = 1e-5                     # LayerNorm eps (PyTorch default)
Y_LO, Y_HI = 0.0, 10.0

VOCAB_PAD = 56                 # VOCAB padded to a multiple of 8 sublanes
RAT_PAD = 16                   # RAT padded to a multiple of 8 sublanes

# -------- packed weight slab layout (sublane offsets, all multiples of 8; 128 lanes, f32) -----
OFF_WHH = 0                       # (HID, 4H)        W_hh^T
OFF_WGE = OFF_WHH + HID           # (VOCAB_PAD, 4H)  embedding @ W_ih_emb^T  (gate proj of emb)
OFF_WIR = OFF_WGE + VOCAB_PAD     # (RAT_PAD, 4H)    W_ih_ratings^T
OFF_WF3 = OFF_WIR + RAT_PAD       # (VOCAB_PAD, 128) embedding @ w3[:EMB] in lanes [:EMB]
OFF_W1 = OFF_WF3 + VOCAB_PAD      # (2H, 128)        w1 in lanes [:HID]
OFF_W2 = OFF_W1 + 2 * HID         # (HID, 128)       w2 in lanes [:EMB]
OFF_W3H = OFF_W2 + HID            # (EMB, 128)       w3[EMB:] in lanes [:EMB]
OFF_W4 = OFF_W3H + EMB            # (EMB, 128)       w4 in lane  [:1]
OFF_VEC = OFF_W4 + EMB            # (16, 128)        packed small vectors (biases / LN params)
SLAB_ROWS = OFF_VEC + 16          # = 304


def _layernorm(x, gamma, beta):
    mu = jnp.mean(x, axis=-1, keepdims=True)
    var = jnp.mean((x - mu) ** 2, axis=-1, keepdims=True)
    return (x - mu) * jax.lax.rsqrt(var + EPS) * gamma + beta


# ---------------- single fused kernel: batched embed/proj -> LSTM -> MLP head ----------------
def fused_net_kernel(ids_ref, ratings_ref, slab_ref, out_ref):
    # ----- batched input-side projections (off the recurrent chain) -----
    ids = ids_ref[...]                                       # ((L+1)*B, 1) int32, time-major, target last
    iota_v = jax.lax.broadcasted_iota(jnp.int32, ((L + 1) * BATCH, VOCAB_PAD), 1)
    onehot = (iota_v == ids).astype(jnp.float32)             # ((L+1)*B, VOCAB_PAD)

    wge = slab_ref[OFF_WGE:OFF_WGE + VOCAB_PAD, :]           # (56, 128) emb folded into gate proj
    wir = slab_ref[OFF_WIR:OFF_WIR + RAT_PAD, :]             # (16, 128) ratings gate proj
    vecs = slab_ref[OFF_VEC:OFF_VEC + 16, :]                 # (16, 128) biases / LN params

    gates_x = (jnp.dot(onehot[:L * BATCH, :], wge, preferred_element_type=jnp.float32)
               + jnp.dot(ratings_ref[...], wir, preferred_element_type=jnp.float32)
               + vecs[0:1, :])                               # (L*B, 4H)

    wf3 = slab_ref[OFF_WF3:OFF_WF3 + VOCAB_PAD, :]           # emb folded into fc3
    fut_fc3 = jnp.dot(onehot[L * BATCH:, :], wf3,
                      preferred_element_type=jnp.float32)    # (B, 128), lanes [:EMB] meaningful

    # ----- LSTM recurrence: serial chain is just L tiny h @ W_hh matmuls -----
    whh = slab_ref[OFF_WHH:OFF_WHH + HID, :]                 # (32, 128)
    h = jnp.zeros((BATCH, HID), jnp.float32)
    c = jnp.zeros((BATCH, HID), jnp.float32)
    for t in range(L):
        gates = gates_x[t * BATCH:(t + 1) * BATCH, :] + jnp.dot(
            h, whh, preferred_element_type=jnp.float32)      # (B, 4H)
        sig = jax.nn.sigmoid(gates)                          # one EUP pass over full 128 lanes
        i_g = sig[:, 0 * HID:1 * HID]
        f_g = sig[:, 1 * HID:2 * HID]
        o_g = sig[:, 3 * HID:4 * HID]
        g_g = jnp.tanh(gates[:, 2 * HID:3 * HID])
        c = f_g * c + i_g * g_g
        h = o_g * jnp.tanh(c)

    # ----- head: fc1->LN->ReLU, fc2->LN->ReLU, fc3([fut_emb, h2])->LN->ReLU, fc4 -----
    # split-accumulate over [h, c] (v7x MRB accumulates in place; on v5e/v6e this is
    # one extra small drain on the post-loop tail only).
    w1 = slab_ref[OFF_W1:OFF_W1 + 2 * HID, :]                # (64, 128), lanes [:HID]
    x1 = (jnp.dot(h, w1[:HID, :], preferred_element_type=jnp.float32)
          + jnp.dot(c, w1[HID:, :], preferred_element_type=jnp.float32))[:, :HID] + vecs[1:2, :HID]
    h1 = jnp.maximum(_layernorm(x1, vecs[2:3, :HID], vecs[3:4, :HID]), 0.0)

    w2 = slab_ref[OFF_W2:OFF_W2 + HID, :]                    # (32, 128), lanes [:EMB]
    x2 = jnp.dot(h1, w2, preferred_element_type=jnp.float32)[:, :EMB] + vecs[4:5, :EMB]
    h2 = jnp.maximum(_layernorm(x2, vecs[5:6, :EMB], vecs[6:7, :EMB]), 0.0)

    w3h = slab_ref[OFF_W3H:OFF_W3H + EMB, :]                 # (16, 128), lanes [:EMB]
    x3 = (fut_fc3[:, :EMB]
          + jnp.dot(h2, w3h, preferred_element_type=jnp.float32)[:, :EMB]
          + vecs[7:8, :EMB])
    h3 = jnp.maximum(_layernorm(x3, vecs[8:9, :EMB], vecs[9:10, :EMB]), 0.0)

    w4 = slab_ref[OFF_W4:OFF_W4 + EMB, :]                    # (16, 128), lane [:1]
    logit = jnp.dot(h3, w4, preferred_element_type=jnp.float32)[:, :1] + vecs[10:11, :1]
    out_ref[...] = (Y_HI - Y_LO) * jax.nn.sigmoid(logit) + Y_LO


# ---------------- one-time parameter preprocessing (outside the jitted forward) ----------------
def prepare_params(p):
    """Transpose, fold the embedding table into the LSTM gate projection and fc3,
    and pack everything into one lane-dense (SLAB_ROWS, 128) f32 slab."""
    emb = np.asarray(p["embedding"], np.float32)             # (VOCAB, EMB)
    wih_t = np.asarray(p["w_ih"], np.float32).T              # (D_IN, 4H), rows: [ratings | emb]
    whh_t = np.asarray(p["w_hh"], np.float32).T              # (HID, 4H)
    w1 = np.asarray(p["w1"], np.float32)                     # (2H, H)
    w2 = np.asarray(p["w2"], np.float32)                     # (H, E)
    w3 = np.asarray(p["w3"], np.float32)                     # (2E, E)
    w4 = np.asarray(p["w4"], np.float32)                     # (E, 1)

    slab = np.zeros((SLAB_ROWS, 128), np.float32)
    slab[OFF_WHH:OFF_WHH + HID, :] = whh_t
    slab[OFF_WGE:OFF_WGE + VOCAB, :] = emb @ wih_t[RAT:, :]        # fold emb into gate proj
    slab[OFF_WIR:OFF_WIR + RAT, :] = wih_t[:RAT, :]
    slab[OFF_WF3:OFF_WF3 + VOCAB, :EMB] = emb @ w3[:EMB, :]        # fold emb into fc3
    slab[OFF_W1:OFF_W1 + 2 * HID, :HID] = w1
    slab[OFF_W2:OFF_W2 + HID, :EMB] = w2
    slab[OFF_W3H:OFF_W3H + EMB, :EMB] = w3[EMB:, :]
    slab[OFF_W4:OFF_W4 + EMB, :1] = w4

    v = OFF_VEC
    slab[v + 0, :4 * HID] = np.asarray(p["b_ih"] + p["b_hh"], np.float32)   # fused LSTM bias
    slab[v + 1, :HID] = np.asarray(p["b1"])
    slab[v + 2, :HID] = np.asarray(p["g1"])
    slab[v + 3, :HID] = np.asarray(p["be1"])
    slab[v + 4, :EMB] = np.asarray(p["b2"])
    slab[v + 5, :EMB] = np.asarray(p["g2"])
    slab[v + 6, :EMB] = np.asarray(p["be2"])
    slab[v + 7, :EMB] = np.asarray(p["b3"])
    slab[v + 8, :EMB] = np.asarray(p["g3"])
    slab[v + 9, :EMB] = np.asarray(p["be3"])
    slab[v + 10, :1] = np.asarray(p["b4"])
    return jnp.asarray(slab)


# ---------------- jitted forward: tiny input reorder + exactly one pallas_call ----------------
@jax.jit
def net_forward(X, slab):
    # Tiny wrapper-side reorders/casts (~1 KB of data): keeps all unaligned lane
    # slices of X and int->f32 casts off the kernel's serial chain.
    ids_all = jnp.concatenate(
        [X[:, 1:1 + L].T.reshape(L * BATCH, 1), X[:, 0:1]], axis=0)   # time-major past ids + target
    ids_all = jnp.clip(ids_all, 0, VOCAB - 1).astype(jnp.int32)       # match jnp.take clipping
    ratings_all = (X[:, 1 + L:].astype(jnp.float32)
                   .reshape(BATCH, L, RAT).transpose(1, 0, 2).reshape(L * BATCH, RAT))
    ratings_all = jnp.pad(ratings_all, ((0, 0), (0, RAT_PAD - RAT)))  # lane-pad to 16

    vmem = pl.BlockSpec(memory_space=pltpu.MemorySpace.VMEM)
    # No grid at B=8 (a grid would only add per-step overhead).  For larger batches on
    # v7x, add a leading batch-tile grid with dimension_semantics=("parallel",).
    return pl.pallas_call(
        fused_net_kernel,
        out_shape=jax.ShapeDtypeStruct((BATCH, 1), jnp.float32),
        in_specs=[vmem, vmem, vmem],
        out_specs=vmem,
        cost_estimate=pl.CostEstimate(
            flops=2_400_000, transcendentals=15_400, bytes_accessed=161_000),
    )(ids_all, ratings_all, slab)


# ---------------- pure-JAX reference (for correctness check) ----------------
def net_forward_ref(X, params):
    target_id = X[:, 0]
    past_ids = X[:, 1:L + 1]
    past_ratings = X[:, L + 1:].reshape(-1, L, RAT).astype(jnp.float32)
    emb_tbl = params["embedding"]
    history_emb = jnp.take(emb_tbl, past_ids, axis=0)
    future_emb = jnp.take(emb_tbl, target_id, axis=0)
    xs = jnp.transpose(jnp.concatenate([past_ratings, history_emb], axis=2), (1, 0, 2))

    def step(carry, x_t):
        h, c = carry
        gates = x_t @ params["w_ih"].T + h @ params["w_hh"].T + params["b_ih"] + params["b_hh"]
        i_g = jax.nn.sigmoid(gates[:, 0 * HID:1 * HID])
        f_g = jax.nn.sigmoid(gates[:, 1 * HID:2 * HID])
        g_g = jnp.tanh(gates[:, 2 * HID:3 * HID])
        o_g = jax.nn.sigmoid(gates[:, 3 * HID:4 * HID])
        c = f_g * c + i_g * g_g
        h = o_g * jnp.tanh(c)
        return (h, c), None

    (h_n, c_n), _ = jax.lax.scan(step, (jnp.zeros((BATCH, HID)), jnp.zeros((BATCH, HID))), xs)
    hc = jnp.concatenate([h_n, c_n], axis=1)

    def ln(x, g, b):
        mu = jnp.mean(x, -1, keepdims=True)
        var = jnp.mean((x - mu) ** 2, -1, keepdims=True)
        return (x - mu) * jax.lax.rsqrt(var + EPS) * g + b

    h1 = jnp.maximum(ln(hc @ params["w1"] + params["b1"], params["g1"], params["be1"]), 0.0)
    h2 = jnp.maximum(ln(h1 @ params["w2"] + params["b2"], params["g2"], params["be2"]), 0.0)
    rec = jnp.concatenate([future_emb, h2], axis=1)
    h3 = jnp.maximum(ln(rec @ params["w3"] + params["b3"], params["g3"], params["be3"]), 0.0)
    logit = h3 @ params["w4"] + params["b4"]
    return (Y_HI - Y_LO) * jax.nn.sigmoid(logit) + Y_LO


# ---------------- deterministic parameter init ----------------
def init_params(key):
    keys = jax.random.split(key, 16)
    s = 0.1
    return {
        "embedding": jax.random.normal(keys[0], (VOCAB, EMB), jnp.float32) * s,
        # LSTM (PyTorch layout: weight_ih (4H, D_IN), weight_hh (4H, H), gate order i,f,g,o)
        "w_ih": jax.random.normal(keys[1], (4 * HID, D_IN), jnp.float32) * s,
        "w_hh": jax.random.normal(keys[2], (4 * HID, HID), jnp.float32) * s,
        "b_ih": jax.random.normal(keys[3], (4 * HID,), jnp.float32) * s,
        "b_hh": jax.random.normal(keys[4], (4 * HID,), jnp.float32) * s,
        # fc1: (2H -> H), ln1
        "w1": jax.random.normal(keys[5], (2 * HID, HID), jnp.float32) * s,
        "b1": jax.random.normal(keys[6], (HID,), jnp.float32) * s,
        "g1": jnp.ones((HID,), jnp.float32),
        "be1": jnp.zeros((HID,), jnp.float32),
        # fc2: (H -> E), ln2
        "w2": jax.random.normal(keys[7], (HID, EMB), jnp.float32) * s,
        "b2": jax.random.normal(keys[8], (EMB,), jnp.float32) * s,
        "g2": jnp.ones((EMB,), jnp.float32),
        "be2": jnp.zeros((EMB,), jnp.float32),
        # fc3: (2E -> E), ln3
        "w3": jax.random.normal(keys[9], (2 * EMB, EMB), jnp.float32) * s,
        "b3": jax.random.normal(keys[10], (EMB,), jnp.float32) * s,
        "g3": jnp.ones((EMB,), jnp.float32),
        "be3": jnp.zeros((EMB,), jnp.float32),
        # fc4: (E -> 1)
        "w4": jax.random.normal(keys[11], (EMB, 1), jnp.float32) * s,
        "b4": jax.random.normal(keys[12], (1,), jnp.float32) * s,
    }


if __name__ == "__main__":
    key = jax.random.PRNGKey(0)
    pkey, k_tgt, k_ids, k_rat = jax.random.split(key, 4)
    params = init_params(pkey)
    slab = prepare_params(params)        # one-time weight preprocessing (outside jit)

    # X: int tensor [target_id | L past ids | L*RAT rating codes]
    target = jax.random.randint(k_tgt, (BATCH, 1), 0, VOCAB, jnp.int32)
    past = jax.random.randint(k_ids, (BATCH, L), 0, VOCAB, jnp.int32)
    ratings = jax.random.randint(k_rat, (BATCH, L * RAT), 0, 2, jnp.int32)
    X = jnp.concatenate([target, past, ratings], axis=1)          # (B, 1 + L + L*RAT) = (8, 121)

    out = net_forward(X, slab)
    out = jax.block_until_ready(out)
    assert out.shape == (BATCH, 1), out.shape

    ref = jax.block_until_ready(net_forward_ref(X, params))
    np.testing.assert_allclose(np.asarray(out), np.asarray(ref), rtol=1e-2, atol=1e-2)

    print("KERNEL_OK")
</pallas_src>

<mosaic_0001>
module attributes {stable_mosaic.version = 11 : i64} {
  func.func @fused_net_kernel(%arg0: memref<88x1xi32, #tpu.memory_space<vmem>>, %arg1: memref<80x16xf32, #tpu.memory_space<vmem>>, %arg2: memref<304x128xf32, #tpu.memory_space<vmem>>, %arg3: memref<8x1xf32, #tpu.memory_space<vmem>>) attributes {dimension_semantics = [], scalar_prefetch = 0 : i64, scratch_operands = 0 : i64, tpu.core_type = #tpu.core_type<tc>} {
    %c0 = arith.constant 0 : index
    %c0_0 = arith.constant 0 : index
    %0 = vector.load %arg0[%c0, %c0_0] : memref<88x1xi32, #tpu.memory_space<vmem>>, vector<88x1xi32>
    %1 = tpu.iota {dimensions = array<i32: 1>} : vector<88x56xi32>
    %2 = vector.broadcast %0 : vector<88x1xi32> to vector<88x56xi32>
    %3 = arith.cmpi eq, %1, %2 : vector<88x56xi32>
    %4 = arith.extui %3 : vector<88x56xi1> to vector<88x56xi32>
    %5 = arith.sitofp %4 : vector<88x56xi32> to vector<88x56xf32>
    %c32 = arith.constant 32 : index
    %c0_1 = arith.constant 0 : index
    %6 = vector.load %arg2[%c32, %c0_1] : memref<304x128xf32, #tpu.memory_space<vmem>>, vector<56x128xf32>
    %c88 = arith.constant 88 : index
    %c0_2 = arith.constant 0 : index
    %7 = vector.load %arg2[%c88, %c0_2] : memref<304x128xf32, #tpu.memory_space<vmem>>, vector<16x128xf32>
    %c288 = arith.constant 288 : index
    %c0_3 = arith.constant 0 : index
    %8 = vector.load %arg2[%c288, %c0_3] : memref<304x128xf32, #tpu.memory_space<vmem>>, vector<16x128xf32>
    %9 = vector.extract_strided_slice %5 {offsets = [0, 0], sizes = [80, 56], strides = [1, 1]} : vector<88x56xf32> to vector<80x56xf32>
    %cst = arith.constant dense<0.000000e+00> : vector<80x128xf32>
    %10 = tpu.matmul %9, %6, %cst {dimension_numbers = #tpu.dot_dimension_numbers<[1], [0], [0], [1], [0, 0, 1, 1], [], []>} : vector<80x56xf32>, vector<56x128xf32>, vector<80x128xf32> -> vector<80x128xf32>
    %c0_4 = arith.constant 0 : index
    %c0_5 = arith.constant 0 : index
    %11 = vector.load %arg1[%c0_4, %c0_5] : memref<80x16xf32, #tpu.memory_space<vmem>>, vector<80x16xf32>
    %cst_6 = arith.constant dense<0.000000e+00> : vector<80x128xf32>
    %12 = tpu.matmul %11, %7, %cst_6 {dimension_numbers = #tpu.dot_dimension_numbers<[1], [0], [0], [1], [0, 0, 1, 1], [], []>} : vector<80x16xf32>, vector<16x128xf32>, vector<80x128xf32> -> vector<80x128xf32>
    %13 = arith.addf %10, %12 : vector<80x128xf32>
    %14 = vector.extract_strided_slice %8 {offsets = [0, 0], sizes = [1, 128], strides = [1, 1]} : vector<16x128xf32> to vector<1x128xf32>
    %15 = vector.broadcast %14 : vector<1x128xf32> to vector<80x128xf32>
    %16 = arith.addf %13, %15 : vector<80x128xf32>
    %c104 = arith.constant 104 : index
    %c0_7 = arith.constant 0 : index
    %17 = vector.load %arg2[%c104, %c0_7] : memref<304x128xf32, #tpu.memory_space<vmem>>, vector<56x128xf32>
    %18 = vector.extract_strided_slice %5 {offsets = [80, 0], sizes = [8, 56], strides = [1, 1]} : vector<88x56xf32> to vector<8x56xf32>
    %cst_8 = arith.constant dense<0.000000e+00> : vector<8x128xf32>
    %19 = tpu.matmul %18, %17, %cst_8 {dimension_numbers = #tpu.dot_dimension_numbers<[1], [0], [0], [1], [0, 0, 1, 1], [], []>} : vector<8x56xf32>, vector<56x128xf32>, vector<8x128xf32> -> vector<8x128xf32>
    %c0_9 = arith.constant 0 : index
    %c0_10 = arith.constant 0 : index
    %20 = vector.load %arg2[%c0_9, %c0_10] : memref<304x128xf32, #tpu.memory_space<vmem>>, vector<32x128xf32>
    %cst_11 = arith.constant 0.000000e+00 : f32
    %21 = vector.broadcast %cst_11 : f32 to vector<8x32xf32>
    %cst_12 = arith.constant 0.000000e+00 : f32
    %22 = vector.broadcast %cst_12 : f32 to vector<8x32xf32>
    %23 = vector.extract_strided_slice %16 {offsets = [0, 0], sizes = [8, 128], strides = [1, 1]} : vector<80x128xf32> to vector<8x128xf32>
    %cst_13 = arith.constant dense<0.000000e+00> : vector<8x128xf32>
    %24 = tpu.matmul %21, %20, %cst_13 {dimension_numbers = #tpu.dot_dimension_numbers<[1], [0], [0], [1], [0, 0, 1, 1], [], []>} : vector<8x32xf32>, vector<32x128xf32>, vector<8x128xf32> -> vector<8x128xf32>
    %25 = arith.addf %23, %24 : vector<8x128xf32>
    %26 = arith.negf %25 : vector<8x128xf32>
    %27 = math.exp %26 : vector<8x128xf32>
    %cst_14 = arith.constant 1.000000e+00 : f32
    %28 = vector.broadcast %cst_14 : f32 to vector<8x128xf32>
    %29 = arith.addf %28, %27 : vector<8x128xf32>
    %30 = arith.divf %28, %29 : vector<8x128xf32>
    %31 = vector.extract_strided_slice %30 {offsets = [0, 0], sizes = [8, 32], strides = [1, 1]} : vector<8x128xf32> to vector<8x32xf32>
    %32 = vector.extract_strided_slice %30 {offsets = [0, 32], sizes = [8, 32], strides = [1, 1]} : vector<8x128xf32> to vector<8x32xf32>
    %33 = vector.extract_strided_slice %30 {offsets = [0, 96], sizes = [8, 32], strides = [1, 1]} : vector<8x128xf32> to vector<8x32xf32>
    %34 = vector.extract_strided_slice %25 {offsets = [0, 64], sizes = [8, 32], strides = [1, 1]} : vector<8x128xf32> to vector<8x32xf32>
    %35 = math.tanh %34 : vector<8x32xf32>
    %36 = arith.mulf %32, %22 : vector<8x32xf32>
    %37 = arith.mulf %31, %35 : vector<8x32xf32>
    %38 = arith.addf %36, %37 : vector<8x32xf32>
    %39 = math.tanh %38 : vector<8x32xf32>
    %40 = arith.mulf %33, %39 : vector<8x32xf32>
    %41 = vector.extract_strided_slice %16 {offsets = [8, 0], sizes = [8, 128], strides = [1, 1]} : vector<80x128xf32> to vector<8x128xf32>
    %cst_15 = arith.constant dense<0.000000e+00> : vector<8x128xf32>
    %42 = tpu.matmul %40, %20, %cst_15 {dimension_numbers = #tpu.dot_dimension_numbers<[1], [0], [0], [1], [0, 0, 1, 1], [], []>} : vector<8x32xf32>, vector<32x128xf32>, vector<8x128xf32> -> vector<8x128xf32>
    %43 = arith.addf %41, %42 : vector<8x128xf32>
    %44 = arith.negf %43 : vector<8x128xf32>
    %45 = math.exp %44 : vector<8x128xf32>
    %cst_16 = arith.constant 1.000000e+00 : f32
    %46 = vector.broadcast %cst_16 : f32 to vector<8x128xf32>
    %47 = arith.addf %46, %45 : vector<8x128xf32>
    %48 = arith.divf %46, %47 : vector<8x128xf32>
    %49 = vector.extract_strided_slice %48 {offsets = [0, 0], sizes = [8, 32], strides = [1, 1]} : vector<8x128xf32> to vector<8x32xf32>
    %50 = vector.extract_strided_slice %48 {offsets = [0, 32], sizes = [8, 32], strides = [1, 1]} : vector<8x128xf32> to vector<8x32xf32>
    %51 = vector.extract_strided_slice %48 {offsets = [0, 96], sizes = [8, 32], strides = [1, 1]} : vector<8x128xf32> to vector<8x32xf32>
    %52 = vector.extract_strided_slice %43 {offsets = [0, 64], sizes = [8, 32], strides = [1, 1]} : vector<8x128xf32> to vector<8x32xf32>
    %53 = math.tanh %52 : vector<8x32xf32>
    %54 = arith.mulf %50, %38 : vector<8x32xf32>
    %55 = arith.mulf %49, %53 : vector<8x32xf32>
    %56 = arith.addf %54, %55 : vector<8x32xf32>
    %57 = math.tanh %56 : vector<8x32xf32>
    %58 = arith.mulf %51, %57 : vector<8x32xf32>
    %59 = vector.extract_strided_slice %16 {offsets = [16, 0], sizes = [8, 128], strides = [1, 1]} : vector<80x128xf32> to vector<8x128xf32>
    %cst_17 = arith.constant dense<0.000000e+00> : vector<8x128xf32>
    %60 = tpu.matmul %58, %20, %cst_17 {dimension_numbers = #tpu.dot_dimension_numbers<[1], [0], [0], [1], [0, 0, 1, 1], [], []>} : vector<8x32xf32>, vector<32x128xf32>, vector<8x128xf32> -> vector<8x128xf32>
    %61 = arith.addf %59, %60 : vector<8x128xf32>
    %62 = arith.negf %61 : vector<8x128xf32>
    %63 = math.exp %62 : vector<8x128xf32>
    %cst_18 = arith.constant 1.000000e+00 : f32
    %64 = vector.broadcast %cst_18 : f32 to vector<8x128xf32>
    %65 = arith.addf %64, %63 : vector<8x128xf32>
    %66 = arith.divf %64, %65 : vector<8x128xf32>
    %67 = vector.extract_strided_slice %66 {offsets = [0, 0], sizes = [8, 32], strides = [1, 1]} : vector<8x128xf32> to vector<8x32xf32>
    %68 = vector.extract_strided_slice %66 {offsets = [0, 32], sizes = [8, 32], strides = [1, 1]} : vector<8x128xf32> to vector<8x32xf32>
    %69 = vector.extract_strided_slice %66 {offsets = [0, 96], sizes = [8, 32], strides = [1, 1]} : vector<8x128xf32> to vector<8x32xf32>
    %70 = vector.extract_strided_slice %61 {offsets = [0, 64], sizes = [8, 32], strides = [1, 1]} : vector<8x128xf32> to vector<8x32xf32>
    %71 = math.tanh %70 : vector<8x32xf32>
    %72 = arith.mulf %68, %56 : vector<8x32xf32>
    %73 = arith.mulf %67, %71 : vector<8x32xf32>
    %74 = arith.addf %72, %73 : vector<8x32xf32>
    %75 = math.tanh %74 : vector<8x32xf32>
    %76 = arith.mulf %69, %75 : vector<8x32xf32>
    %77 = vector.extract_strided_slice %16 {offsets = [24, 0], sizes = [8, 128], strides = [1, 1]} : vector<80x128xf32> to vector<8x128xf32>
    %cst_19 = arith.constant dense<0.000000e+00> : vector<8x128xf32>
    %78 = tpu.matmul %76, %20, %cst_19 {dimension_numbers = #tpu.dot_dimension_numbers<[1], [0], [0], [1], [0, 0, 1, 1], [], []>} : vector<8x32xf32>, vector<32x128xf32>, vector<8x128xf32> -> vector<8x128xf32>
    %79 = arith.addf %77, %78 : vector<8x128xf32>
    %80 = arith.negf %79 : vector<8x128xf32>
    %81 = math.exp %80 : vector<8x128xf32>
    %cst_20 = arith.constant 1.000000e+00 : f32
    %82 = vector.broadcast %cst_20 : f32 to vector<8x128xf32>
    %83 = arith.addf %82, %81 : vector<8x128xf32>
    %84 = arith.divf %82, %83 : vector<8x128xf32>
    %85 = vector.extract_strided_slice %84 {offsets = [0, 0], sizes = [8, 32], strides = [1, 1]} : vector<8x128xf32> to vector<8x32xf32>
    %86 = vector.extract_strided_slice %84 {offsets = [0, 32], sizes = [8, 32], strides = [1, 1]} : vector<8x128xf32> to vector<8x32xf32>
    %87 = vector.extract_strided_slice %84 {offsets = [0, 96], sizes = [8, 32], strides = [1, 1]} : vector<8x128xf32> to vector<8x32xf32>
    %88 = vector.extract_strided_slice %79 {offsets = [0, 64], sizes = [8, 32], strides = [1, 1]} : vector<8x128xf32> to vector<8x32xf32>
    %89 = math.tanh %88 : vector<8x32xf32>
    %90 = arith.mulf %86, %74 : vector<8x32xf32>
    %91 = arith.mulf %85, %89 : vector<8x32xf32>
    %92 = arith.addf %90, %91 : vector<8x32xf32>
    %93 = math.tanh %92 : vector<8x32xf32>
    %94 = arith.mulf %87, %93 : vector<8x32xf32>
    %95 = vector.extract_strided_slice %16 {offsets = [32, 0], sizes = [8, 128], strides = [1, 1]} : vector<80x128xf32> to vector<8x128xf32>
    %cst_21 = arith.constant dense<0.000000e+00> : vector<8x128xf32>
    %96 = tpu.matmul %94, %20, %cst_21 {dimension_numbers = #tpu.dot_dimension_numbers<[1], [0], [0], [1], [0, 0, 1, 1], [], []>} : vector<8x32xf32>, vector<32x128xf32>, vector<8x128xf32> -> vector<8x128xf32>
    %97 = arith.addf %95, %96 : vector<8x128xf32>
    %98 = arith.negf %97 : vector<8x128xf32>
    %99 = math.exp %98 : vector<8x128xf32>
    %cst_22 = arith.constant 1.000000e+00 : f32
    %100 = vector.broadcast %cst_22 : f32 to vector<8x128xf32>
    %101 = arith.addf %100, %99 : vector<8x128xf32>
    %102 = arith.divf %100, %101 : vector<8x128xf32>
    %103 = vector.extract_strided_slice %102 {offsets = [0, 0], sizes = [8, 32], strides = [1, 1]} : vector<8x128xf32> to vector<8x32xf32>
    %104 = vector.extract_strided_slice %102 {offsets = [0, 32], sizes = [8, 32], strides = [1, 1]} : vector<8x128xf32> to vector<8x32xf32>
    %105 = vector.extract_strided_slice %102 {offsets = [0, 96], sizes = [8, 32], strides = [1, 1]} : vector<8x128xf32> to vector<8x32xf32>
    %106 = vector.extract_strided_slice %97 {offsets = [0, 64], sizes = [8, 32], strides = [1, 1]} : vector<8x128xf32> to vector<8x32xf32>
    %107 = math.tanh %106 : vector<8x32xf32>
    %108 = arith.mulf %104, %92 : vector<8x32xf32>
    %109 = arith.mulf %103, %107 : vector<8x32xf32>
    %110 = arith.addf %108, %109 : vector<8x32xf32>
    %111 = math.tanh %110 : vector<8x32xf32>
    %112 = arith.mulf %105, %111 : vector<8x32xf32>
    %113 = vector.extract_strided_slice %16 {offsets = [40, 0], sizes = [8, 128], strides = [1, 1]} : vector<80x128xf32> to vector<8x128xf32>
    %cst_23 = arith.constant dense<0.000000e+00> : vector<8x128xf32>
    %114 = tpu.matmul %112, %20, %cst_23 {dimension_numbers = #tpu.dot_dimension_numbers<[1], [0], [0], [1], [0, 0, 1, 1], [], []>} : vector<8x32xf32>, vector<32x128xf32>, vector<8x128xf32> -> vector<8x128xf32>
    %115 = arith.addf %113, %114 : vector<8x128xf32>
    %116 = arith.negf %115 : vector<8x128xf32>
    %117 = math.exp %116 : vector<8x128xf32>
    %cst_24 = arith.constant 1.000000e+00 : f32
    %118 = vector.broadcast %cst_24 : f32 to vector<8x128xf32>
    %119 = arith.addf %118, %117 : vector<8x128xf32>
    %120 = arith.divf %118, %119 : vector<8x128xf32>
    %121 = vector.extract_strided_slice %120 {offsets = [0, 0], sizes = [8, 32], strides = [1, 1]} : vector<8x128xf32> to vector<8x32xf32>
    %122 = vector.extract_strided_slice %120 {offsets = [0, 32], sizes = [8, 32], strides = [1, 1]} : vector<8x128xf32> to vector<8x32xf32>
    %123 = vector.extract_strided_slice %120 {offsets = [0, 96], sizes = [8, 32], strides = [1, 1]} : vector<8x128xf32> to vector<8x32xf32>
    %124 = vector.extract_strided_slice %115 {offsets = [0, 64], sizes = [8, 32], strides = [1, 1]} : vector<8x128xf32> to vector<8x32xf32>
    %125 = math.tanh %124 : vector<8x32xf32>
    %126 = arith.mulf %122, %110 : vector<8x32xf32>
    %127 = arith.mulf %121, %125 : vector<8x32xf32>
    %128 = arith.addf %126, %127 : vector<8x32xf32>
    %129 = math.tanh %128 : vector<8x32xf32>
    %130 = arith.mulf %123, %129 : vector<8x32xf32>
    %131 = vector.extract_strided_slice %16 {offsets = [48, 0], sizes = [8, 128], strides = [1, 1]} : vector<80x128xf32> to vector<8x128xf32>
    %cst_25 = arith.constant dense<0.000000e+00> : vector<8x128xf32>
    %132 = tpu.matmul %130, %20, %cst_25 {dimension_numbers = #tpu.dot_dimension_numbers<[1], [0], [0], [1], [0, 0, 1, 1], [], []>} : vector<8x32xf32>, vector<32x128xf32>, vector<8x128xf32> -> vector<8x128xf32>
    %133 = arith.addf %131, %132 : vector<8x128xf32>
    %134 = arith.negf %133 : vector<8x128xf32>
    %135 = math.exp %134 : vector<8x128xf32>
    %cst_26 = arith.constant 1.000000e+00 : f32
    %136 = vector.broadcast %cst_26 : f32 to vector<8x128xf32>
    %137 = arith.addf %136, %135 : vector<8x128xf32>
    %138 = arith.divf %136, %137 : vector<8x128xf32>
    %139 = vector.extract_strided_slice %138 {offsets = [0, 0], sizes = [8, 32], strides = [1, 1]} : vector<8x128xf32> to vector<8x32xf32>
    %140 = vector.extract_strided_slice %138 {offsets = [0, 32], sizes = [8, 32], strides = [1, 1]} : vector<8x128xf32> to vector<8x32xf32>
    %141 = vector.extract_strided_slice %138 {offsets = [0, 96], sizes = [8, 32], strides = [1, 1]} : vector<8x128xf32> to vector<8x32xf32>
    %142 = vector.extract_strided_slice %133 {offsets = [0, 64], sizes = [8, 32], strides = [1, 1]} : vector<8x128xf32> to vector<8x32xf32>
    %143 = math.tanh %142 : vector<8x32xf32>
    %144 = arith.mulf %140, %128 : vector<8x32xf32>
    %145 = arith.mulf %139, %143 : vector<8x32xf32>
    %146 = arith.addf %144, %145 : vector<8x32xf32>
    %147 = math.tanh %146 : vector<8x32xf32>
    %148 = arith.mulf %141, %147 : vector<8x32xf32>
    %149 = vector.extract_strided_slice %16 {offsets = [56, 0], sizes = [8, 128], strides = [1, 1]} : vector<80x128xf32> to vector<8x128xf32>
    %cst_27 = arith.constant dense<0.000000e+00> : vector<8x128xf32>
    %150 = tpu.matmul %148, %20, %cst_27 {dimension_numbers = #tpu.dot_dimension_numbers<[1], [0], [0], [1], [0, 0, 1, 1], [], []>} : vector<8x32xf32>, vector<32x128xf32>, vector<8x128xf32> -> vector<8x128xf32>
    %151 = arith.addf %149, %150 : vector<8x128xf32>
    %152 = arith.negf %151 : vector<8x128xf32>
    %153 = math.exp %152 : vector<8x128xf32>
    %cst_28 = arith.constant 1.000000e+00 : f32
    %154 = vector.broadcast %cst_28 : f32 to vector<8x128xf32>
    %155 = arith.addf %154, %153 : vector<8x128xf32>
    %156 = arith.divf %154, %155 : vector<8x128xf32>
    %157 = vector.extract_strided_slice %156 {offsets = [0, 0], sizes = [8, 32], strides = [1, 1]} : vector<8x128xf32> to vector<8x32xf32>
    %158 = vector.extract_strided_slice %156 {offsets = [0, 32], sizes = [8, 32], strides = [1, 1]} : vector<8x128xf32> to vector<8x32xf32>
    %159 = vector.extract_strided_slice %156 {offsets = [0, 96], sizes = [8, 32], strides = [1, 1]} : vector<8x128xf32> to vector<8x32xf32>
    %160 = vector.extract_strided_slice %151 {offsets = [0, 64], sizes = [8, 32], strides = [1, 1]} : vector<8x128xf32> to vector<8x32xf32>
    %161 = math.tanh %160 : vector<8x32xf32>
    %162 = arith.mulf %158, %146 : vector<8x32xf32>
    %163 = arith.mulf %157, %161 : vector<8x32xf32>
    %164 = arith.addf %162, %163 : vector<8x32xf32>
    %165 = math.tanh %164 : vector<8x32xf32>
    %166 = arith.mulf %159, %165 : vector<8x32xf32>
    %167 = vector.extract_strided_slice %16 {offsets = [64, 0], sizes = [8, 128], strides = [1, 1]} : vector<80x128xf32> to vector<8x128xf32>
    %cst_29 = arith.constant dense<0.000000e+00> : vector<8x128xf32>
    %168 = tpu.matmul %166, %20, %cst_29 {dimension_numbers = #tpu.dot_dimension_numbers<[1], [0], [0], [1], [0, 0, 1, 1], [], []>} : vector<8x32xf32>, vector<32x128xf32>, vector<8x128xf32> -> vector<8x128xf32>
    %169 = arith.addf %167, %168 : vector<8x128xf32>
    %170 = arith.negf %169 : vector<8x128xf32>
    %171 = math.exp %170 : vector<8x128xf32>
    %cst_30 = arith.constant 1.000000e+00 : f32
    %172 = vector.broadcast %cst_30 : f32 to vector<8x128xf32>
    %173 = arith.addf %172, %171 : vector<8x128xf32>
    %174 = arith.divf %172, %173 : vector<8x128xf32>
    %175 = vector.extract_strided_slice %174 {offsets = [0, 0], sizes = [8, 32], strides = [1, 1]} : vector<8x128xf32> to vector<8x32xf32>
    %176 = vector.extract_strided_slice %174 {offsets = [0, 32], sizes = [8, 32], strides = [1, 1]} : vector<8x128xf32> to vector<8x32xf32>
    %177 = vector.extract_strided_slice %174 {offsets = [0, 96], sizes = [8, 32], strides = [1, 1]} : vector<8x128xf32> to vector<8x32xf32>
    %178 = vector.extract_strided_slice %169 {offsets = [0, 64], sizes = [8, 32], strides = [1, 1]} : vector<8x128xf32> to vector<8x32xf32>
    %179 = math.tanh %178 : vector<8x32xf32>
    %180 = arith.mulf %176, %164 : vector<8x32xf32>
    %181 = arith.mulf %175, %179 : vector<8x32xf32>
    %182 = arith.addf %180, %181 : vector<8x32xf32>
    %183 = math.tanh %182 : vector<8x32xf32>
    %184 = arith.mulf %177, %183 : vector<8x32xf32>
    %185 = vector.extract_strided_slice %16 {offsets = [72, 0], sizes = [8, 128], strides = [1, 1]} : vector<80x128xf32> to vector<8x128xf32>
    %cst_31 = arith.constant dense<0.000000e+00> : vector<8x128xf32>
    %186 = tpu.matmul %184, %20, %cst_31 {dimension_numbers = #tpu.dot_dimension_numbers<[1], [0], [0], [1], [0, 0, 1, 1], [], []>} : vector<8x32xf32>, vector<32x128xf32>, vector<8x128xf32> -> vector<8x128xf32>
    %187 = arith.addf %185, %186 : vector<8x128xf32>
    %188 = arith.negf %187 : vector<8x128xf32>
    %189 = math.exp %188 : vector<8x128xf32>
    %cst_32 = arith.constant 1.000000e+00 : f32
    %190 = vector.broadcast %cst_32 : f32 to vector<8x128xf32>
    %191 = arith.addf %190, %189 : vector<8x128xf32>
    %192 = arith.divf %190, %191 : vector<8x128xf32>
    %193 = vector.extract_strided_slice %192 {offsets = [0, 0], sizes = [8, 32], strides = [1, 1]} : vector<8x128xf32> to vector<8x32xf32>
    %194 = vector.extract_strided_slice %192 {offsets = [0, 32], sizes = [8, 32], strides = [1, 1]} : vector<8x128xf32> to vector<8x32xf32>
    %195 = vector.extract_strided_slice %192 {offsets = [0, 96], sizes = [8, 32], strides = [1, 1]} : vector<8x128xf32> to vector<8x32xf32>
    %196 = vector.extract_strided_slice %187 {offsets = [0, 64], sizes = [8, 32], strides = [1, 1]} : vector<8x128xf32> to vector<8x32xf32>
    %197 = math.tanh %196 : vector<8x32xf32>
    %198 = arith.mulf %194, %182 : vector<8x32xf32>
    %199 = arith.mulf %193, %197 : vector<8x32xf32>
    %200 = arith.addf %198, %199 : vector<8x32xf32>
    %201 = math.tanh %200 : vector<8x32xf32>
    %202 = arith.mulf %195, %201 : vector<8x32xf32>
    %c160 = arith.constant 160 : index
    %c0_33 = arith.constant 0 : index
    %203 = vector.load %arg2[%c160, %c0_33] : memref<304x128xf32, #tpu.memory_space<vmem>>, vector<64x128xf32>
    %204 = vector.extract_strided_slice %203 {offsets = [0, 0], sizes = [32, 128], strides = [1, 1]} : vector<64x128xf32> to vector<32x128xf32>
    %cst_34 = arith.constant dense<0.000000e+00> : vector<8x128xf32>
    %205 = tpu.matmul %202, %204, %cst_34 {dimension_numbers = #tpu.dot_dimension_numbers<[1], [0], [0], [1], [0, 0, 1, 1], [], []>} : vector<8x32xf32>, vector<32x128xf32>, vector<8x128xf32> -> vector<8x128xf32>
    %206 = vector.extract_strided_slice %203 {offsets = [32, 0], sizes = [32, 128], strides = [1, 1]} : vector<64x128xf32> to vector<32x128xf32>
    %cst_35 = arith.constant dense<0.000000e+00> : vector<8x128xf32>
    %207 = tpu.matmul %200, %206, %cst_35 {dimension_numbers = #tpu.dot_dimension_numbers<[1], [0], [0], [1], [0, 0, 1, 1], [], []>} : vector<8x32xf32>, vector<32x128xf32>, vector<8x128xf32> -> vector<8x128xf32>
    %208 = arith.addf %205, %207 : vector<8x128xf32>
    %209 = vector.extract_strided_slice %208 {offsets = [0, 0], sizes = [8, 32], strides = [1, 1]} : vector<8x128xf32> to vector<8x32xf32>
    %210 = vector.extract_strided_slice %8 {offsets = [1, 0], sizes = [1, 32], strides = [1, 1]} : vector<16x128xf32> to vector<1x32xf32>
    %211 = vector.broadcast %210 : vector<1x32xf32> to vector<8x32xf32>
    %212 = arith.addf %209, %211 : vector<8x32xf32>
    %213 = vector.extract_strided_slice %8 {offsets = [2, 0], sizes = [1, 32], strides = [1, 1]} : vector<16x128xf32> to vector<1x32xf32>
    %214 = vector.extract_strided_slice %8 {offsets = [3, 0], sizes = [1, 32], strides = [1, 1]} : vector<16x128xf32> to vector<1x32xf32>
    %cst_36 = arith.constant dense<0.000000e+00> : vector<8xf32>
    %215 = vector.multi_reduction <add>, %212, %cst_36 [1] : vector<8x32xf32> to vector<8xf32>
    %216 = vector.shape_cast %215 : vector<8xf32> to vector<8x1xf32>
    %cst_37 = arith.constant 3.200000e+01 : f32
    %217 = vector.broadcast %cst_37 : f32 to vector<8x1xf32>
    %218 = arith.divf %216, %217 : vector<8x1xf32>
    %219 = vector.broadcast %218 : vector<8x1xf32> to vector<8x32xf32>
    %220 = arith.subf %212, %219 : vector<8x32xf32>
    %221 = arith.mulf %220, %220 : vector<8x32xf32>
    %cst_38 = arith.constant dense<0.000000e+00> : vector<8xf32>
    %222 = vector.multi_reduction <add>, %221, %cst_38 [1] : vector<8x32xf32> to vector<8xf32>
    %223 = vector.shape_cast %222 : vector<8xf32> to vector<8x1xf32>
    %cst_39 = arith.constant 3.200000e+01 : f32
    %224 = vector.broadcast %cst_39 : f32 to vector<8x1xf32>
    %225 = arith.divf %223, %224 : vector<8x1xf32>
    %226 = vector.broadcast %218 : vector<8x1xf32> to vector<8x32xf32>
    %227 = arith.subf %212, %226 : vector<8x32xf32>
    %cst_40 = arith.constant 9.99999974E-6 : f32
    %228 = vector.broadcast %cst_40 : f32 to vector<8x1xf32>
    %229 = arith.addf %225, %228 : vector<8x1xf32>
    %230 = math.rsqrt %229 : vector<8x1xf32>
    %231 = vector.broadcast %230 : vector<8x1xf32> to vector<8x32xf32>
    %232 = arith.mulf %227, %231 : vector<8x32xf32>
    %233 = vector.broadcast %213 : vector<1x32xf32> to vector<8x32xf32>
    %234 = arith.mulf %232, %233 : vector<8x32xf32>
    %235 = vector.broadcast %214 : vector<1x32xf32> to vector<8x32xf32>
    %236 = arith.addf %234, %235 : vector<8x32xf32>
    %cst_41 = arith.constant 0.000000e+00 : f32
    %237 = vector.broadcast %cst_41 : f32 to vector<8x32xf32>
    %238 = arith.maximumf %236, %237 : vector<8x32xf32>
    %c224 = arith.constant 224 : index
    %c0_42 = arith.constant 0 : index
    %239 = vector.load %arg2[%c224, %c0_42] : memref<304x128xf32, #tpu.memory_space<vmem>>, vector<32x128xf32>
    %cst_43 = arith.constant dense<0.000000e+00> : vector<8x128xf32>
    %240 = tpu.matmul %238, %239, %cst_43 {dimension_numbers = #tpu.dot_dimension_numbers<[1], [0], [0], [1], [0, 0, 1, 1], [], []>} : vector<8x32xf32>, vector<32x128xf32>, vector<8x128xf32> -> vector<8x128xf32>
    %241 = vector.extract_strided_slice %240 {offsets = [0, 0], sizes = [8, 16], strides = [1, 1]} : vector<8x128xf32> to vector<8x16xf32>
    %242 = vector.extract_strided_slice %8 {offsets = [4, 0], sizes = [1, 16], strides = [1, 1]} : vector<16x128xf32> to vector<1x16xf32>
    %243 = vector.broadcast %242 : vector<1x16xf32> to vector<8x16xf32>
    %244 = arith.addf %241, %243 : vector<8x16xf32>
    %245 = vector.extract_strided_slice %8 {offsets = [5, 0], sizes = [1, 16], strides = [1, 1]} : vector<16x128xf32> to vector<1x16xf32>
    %246 = vector.extract_strided_slice %8 {offsets = [6, 0], sizes = [1, 16], strides = [1, 1]} : vector<16x128xf32> to vector<1x16xf32>
    %cst_44 = arith.constant dense<0.000000e+00> : vector<8xf32>
    %247 = vector.multi_reduction <add>, %244, %cst_44 [1] : vector<8x16xf32> to vector<8xf32>
    %248 = vector.shape_cast %247 : vector<8xf32> to vector<8x1xf32>
    %cst_45 = arith.constant 1.600000e+01 : f32
    %249 = vector.broadcast %cst_45 : f32 to vector<8x1xf32>
    %250 = arith.divf %248, %249 : vector<8x1xf32>
    %251 = vector.broadcast %250 : vector<8x1xf32> to vector<8x16xf32>
    %252 = arith.subf %244, %251 : vector<8x16xf32>
    %253 = arith.mulf %252, %252 : vector<8x16xf32>
    %cst_46 = arith.constant dense<0.000000e+00> : vector<8xf32>
    %254 = vector.multi_reduction <add>, %253, %cst_46 [1] : vector<8x16xf32> to vector<8xf32>
    %255 = vector.shape_cast %254 : vector<8xf32> to vector<8x1xf32>
    %cst_47 = arith.constant 1.600000e+01 : f32
    %256 = vector.broadcast %cst_47 : f32 to vector<8x1xf32>
    %257 = arith.divf %255, %256 : vector<8x1xf32>
    %258 = vector.broadcast %250 : vector<8x1xf32> to vector<8x16xf32>
    %259 = arith.subf %244, %258 : vector<8x16xf32>
    %cst_48 = arith.constant 9.99999974E-6 : f32
    %260 = vector.broadcast %cst_48 : f32 to vector<8x1xf32>
    %261 = arith.addf %257, %260 : vector<8x1xf32>
    %262 = math.rsqrt %261 : vector<8x1xf32>
    %263 = vector.broadcast %262 : vector<8x1xf32> to vector<8x16xf32>
    %264 = arith.mulf %259, %263 : vector<8x16xf32>
    %265 = vector.broadcast %245 : vector<1x16xf32> to vector<8x16xf32>
    %266 = arith.mulf %264, %265 : vector<8x16xf32>
    %267 = vector.broadcast %246 : vector<1x16xf32> to vector<8x16xf32>
    %268 = arith.addf %266, %267 : vector<8x16xf32>
    %cst_49 = arith.constant 0.000000e+00 : f32
    %269 = vector.broadcast %cst_49 : f32 to vector<8x16xf32>
    %270 = arith.maximumf %268, %269 : vector<8x16xf32>
    %c256 = arith.constant 256 : index
    %c0_50 = arith.constant 0 : index
    %271 = vector.load %arg2[%c256, %c0_50] : memref<304x128xf32, #tpu.memory_space<vmem>>, vector<16x128xf32>
    %272 = vector.extract_strided_slice %19 {offsets = [0, 0], sizes = [8, 16], strides = [1, 1]} : vector<8x128xf32> to vector<8x16xf32>
    %cst_51 = arith.constant dense<0.000000e+00> : vector<8x128xf32>
    %273 = tpu.matmul %270, %271, %cst_51 {dimension_numbers = #tpu.dot_dimension_numbers<[1], [0], [0], [1], [0, 0, 1, 1], [], []>} : vector<8x16xf32>, vector<16x128xf32>, vector<8x128xf32> -> vector<8x128xf32>
    %274 = vector.extract_strided_slice %273 {offsets = [0, 0], sizes = [8, 16], strides = [1, 1]} : vector<8x128xf32> to vector<8x16xf32>
    %275 = arith.addf %272, %274 : vector<8x16xf32>
    %276 = vector.extract_strided_slice %8 {offsets = [7, 0], sizes = [1, 16], strides = [1, 1]} : vector<16x128xf32> to vector<1x16xf32>
    %277 = vector.broadcast %276 : vector<1x16xf32> to vector<8x16xf32>
    %278 = arith.addf %275, %277 : vector<8x16xf32>
    %279 = vector.extract_strided_slice %8 {offsets = [8, 0], sizes = [1, 16], strides = [1, 1]} : vector<16x128xf32> to vector<1x16xf32>
    %280 = vector.extract_strided_slice %8 {offsets = [9, 0], sizes = [1, 16], strides = [1, 1]} : vector<16x128xf32> to vector<1x16xf32>
    %cst_52 = arith.constant dense<0.000000e+00> : vector<8xf32>
    %281 = vector.multi_reduction <add>, %278, %cst_52 [1] : vector<8x16xf32> to vector<8xf32>
    %282 = vector.shape_cast %281 : vector<8xf32> to vector<8x1xf32>
    %cst_53 = arith.constant 1.600000e+01 : f32
    %283 = vector.broadcast %cst_53 : f32 to vector<8x1xf32>
    %284 = arith.divf %282, %283 : vector<8x1xf32>
    %285 = vector.broadcast %284 : vector<8x1xf32> to vector<8x16xf32>
    %286 = arith.subf %278, %285 : vector<8x16xf32>
    %287 = arith.mulf %286, %286 : vector<8x16xf32>
    %cst_54 = arith.constant dense<0.000000e+00> : vector<8xf32>
    %288 = vector.multi_reduction <add>, %287, %cst_54 [1] : vector<8x16xf32> to vector<8xf32>
    %289 = vector.shape_cast %288 : vector<8xf32> to vector<8x1xf32>
    %cst_55 = arith.constant 1.600000e+01 : f32
    %290 = vector.broadcast %cst_55 : f32 to vector<8x1xf32>
    %291 = arith.divf %289, %290 : vector<8x1xf32>
    %292 = vector.broadcast %284 : vector<8x1xf32> to vector<8x16xf32>
    %293 = arith.subf %278, %292 : vector<8x16xf32>
    %cst_56 = arith.constant 9.99999974E-6 : f32
    %294 = vector.broadcast %cst_56 : f32 to vector<8x1xf32>
    %295 = arith.addf %291, %294 : vector<8x1xf32>
    %296 = math.rsqrt %295 : vector<8x1xf32>
    %297 = vector.broadcast %296 : vector<8x1xf32> to vector<8x16xf32>
    %298 = arith.mulf %293, %297 : vector<8x16xf32>
    %299 = vector.broadcast %279 : vector<1x16xf32> to vector<8x16xf32>
    %300 = arith.mulf %298, %299 : vector<8x16xf32>
    %301 = vector.broadcast %280 : vector<1x16xf32> to vector<8x16xf32>
    %302 = arith.addf %300, %301 : vector<8x16xf32>
    %cst_57 = arith.constant 0.000000e+00 : f32
    %303 = vector.broadcast %cst_57 : f32 to vector<8x16xf32>
    %304 = arith.maximumf %302, %303 : vector<8x16xf32>
    %c272 = arith.constant 272 : index
    %c0_58 = arith.constant 0 : index
    %305 = vector.load %arg2[%c272, %c0_58] : memref<304x128xf32, #tpu.memory_space<vmem>>, vector<16x128xf32>
    %cst_59 = arith.constant dense<0.000000e+00> : vector<8x128xf32>
    %306 = tpu.matmul %304, %305, %cst_59 {dimension_numbers = #tpu.dot_dimension_numbers<[1], [0], [0], [1], [0, 0, 1, 1], [], []>} : vector<8x16xf32>, vector<16x128xf32>, vector<8x128xf32> -> vector<8x128xf32>
    %307 = vector.extract_strided_slice %306 {offsets = [0, 0], sizes = [8, 1], strides = [1, 1]} : vector<8x128xf32> to vector<8x1xf32>
    %308 = vector.extract_strided_slice %8 {offsets = [10, 0], sizes = [1, 1], strides = [1, 1]} : vector<16x128xf32> to vector<1x1xf32>
    %309 = vector.broadcast %308 : vector<1x1xf32> to vector<8x1xf32>
    %310 = arith.addf %307, %309 : vector<8x1xf32>
    %311 = arith.negf %310 : vector<8x1xf32>
    %312 = math.exp %311 : vector<8x1xf32>
    %cst_60 = arith.constant 1.000000e+00 : f32
    %313 = vector.broadcast %cst_60 : f32 to vector<8x1xf32>
    %314 = arith.addf %313, %312 : vector<8x1xf32>
    %315 = arith.divf %313, %314 : vector<8x1xf32>
    %cst_61 = arith.constant 1.000000e+01 : f32
    %316 = vector.broadcast %cst_61 : f32 to vector<8x1xf32>
    %317 = arith.mulf %316, %315 : vector<8x1xf32>
    %cst_62 = arith.constant 0.000000e+00 : f32
    %318 = vector.broadcast %cst_62 : f32 to vector<8x1xf32>
    %319 = arith.addf %317, %318 : vector<8x1xf32>
    %c0_63 = arith.constant 0 : index
    %c0_64 = arith.constant 0 : index
    %320 = vector.load %arg3[%c0_63, %c0_64] : memref<8x1xf32, #tpu.memory_space<vmem>>, vector<8x1xf32>
    tpu.vector_store %arg3[%c0_63, %c0_64], %319 {strides = array<i32>} : memref<8x1xf32, #tpu.memory_space<vmem>>, vector<8x1xf32>,
    return
  }
}

</mosaic_0001>

<bundles_post_ra>
// kernel: net_forward.1
= control target key start
LH: loop header
LB: loop body
LE: loop exit
PB: predicated region body
PF: predicated region fallthrough
CT: control target
= control target key end

     0   :  { %vm114_vm0 = vcmask 130048   ;;  %v2602_v0 = vmov 0   ;;  %v2603_v10 = vmov 0.0|0.0   ;;  %vm2604_vm1 = vmmov 0   ;;  %s2606_s25 = smov 64   ;;  %s2607_s26 = smov 32   ;;  %s3072_s0 = inlined_call_operand.vmem [shape: s32[88,1], index: 0, kind: input, shape index: {}]   ;;  %s3073_s2 = inlined_call_operand.vmem [shape: f32[304,128], index: 2, kind: input, shape index: {}]   ;;  %s3074_s1 = inlined_call_operand.vmem [shape: f32[80,16], index: 1, kind: input, shape index: {}]   ;;  %s3075_s3 = inlined_call_operand.vmem [shape: f32[8,1], index: 3, kind: output, shape index: {}]  }
   0x1   :  { %2510 = vset.pattern.permute.xlu0 %v2602_v0  ;;  %v24_v1 = vld [vmem:[%s3072_s0 + $0x50] sm:$0xff]  ;;  %2511 = vset.pattern.permute.xlu1 %v2602_v0  ;;  %v15_v2 = vld [vmem:[%s3072_s0 + $0x8] sm:$0xff]  ;;  %v100_v3 = vld [vmem:[%s3073_s2 + $0x58] sm:$0xff]  ;;  %v2605_v14 = vmov 0.0   ;;  %v25_v39 = vlaneseq  ;;  %vm260_vm2 = vcmask 457728   ;;  %vm504_vm6 = vcmask 261120  }
   0x2   :  { %58 = vperm.xlu0 %2510, %v24_v1   ;;  %31 = vperm.xlu1 %2511, %v15_v2   ;;  %v101_v4 = vld [vmem:[%s3073_s2 + $0x60] sm:$0xff]  ;;  %v94_v9 = vld [vmem:[%s3073_s2 + $0x28] sm:$0xff]  ;;  %v421_v13 = vld [vmem:[%s3073_s2 + $0x70] sm:$0xff]  ;;  %s2608_s22 = smov 96   ;;  %vm1991_vm15 = vcmask 7168  }
   0x3   :  { %v104_v5 = vld [vmem:[%s3074_s1] sm:$0xff]  ;;  %v2384_v7 = vpack.c.bf16 %v101_v4, %v100_v3  ;;  %2400 = vmatprep.subr.bf16.mxu1 %v2603_v10  ;;  %v420_v12 = vld [vmem:[%s3073_s2 + $0x68] sm:$0xff]  ;;  %2224 = vmatprep.mubr.msk.f32.mxu1 %vm2604_vm1, %v2605_v14  ;;  %v95_v16 = vld [vmem:[%s3073_s2 + $0x30] sm:$0xff]  ;;  %v2734_v40 = vand.u32 127, %v25_v39  ;;  %v2778_v53 = vshrl.u32 %v25_v39, 7 }
   0x4   :  { %v14_v6 = vld [vmem:[%s3072_s0] sm:$0xff]  ;;  %2166 = vmatprep.mubr.msk.f32.mxu0 %vm114_vm0, %v104_v5  ;;  %v2401_v15 = vpack.c.bf16 %v421_v13, %v420_v12  ;;  %v96_v17 = vld [vmem:[%s3073_s2 + $0x38] sm:$0xff]  ;;  %v105_v18 = vld [vmem:[%s3074_s1 + $0x8] sm:$0xff] }
   0x5   :  { %v93_v8 = vld [vmem:[%s3073_s2 + $0x20] sm:$0xff]  ;;  %2385 = vmatprep.subr.bf16.mxu0 %v2384_v7  ;;  %v422_v19 = vld [vmem:[%s3073_s2 + $0x78] sm:$0xff]  ;;  %v106_v21 = vld [vmem:[%s3074_s1 + $0x10] sm:$0xff]  ;;  %v2392_v22 = vpack.c.bf16 %v96_v17, %v95_v16  ;;  %v408_v54 = vsub.s32 0, %v2778_v53 }
   0x6   :  { %v2388_v11 = vpack.c.bf16 %v94_v9, %v93_v8  ;;  %28 = vperm.xlu0 %2510, %v14_v6   ;;  %2387 = vmatpush3.bf16.msra.mxu0 %v2384_v7  ;;  %v423_v20 = vld [vmem:[%s3073_s2 + $0x80] sm:$0xff]  ;;  %v98_v25 = vld [vmem:[%s3073_s2 + $0x48] sm:$0xff]  ;;  %v425_v27 = vld [vmem:[%s3073_s2 + $0x90] sm:$0xff] }
   0x7   :  { %2402 = vmatpush3.bf16.msra.mxu1 %v2401_v15  ;;  %v2404_v23 = vpack.c.bf16 %v423_v20, %v422_v19  ;;  %v97_v24 = vld [vmem:[%s3073_s2 + $0x40] sm:$0xff]  ;;  %v424_v26 = vld [vmem:[%s3073_s2 + $0x88] sm:$0xff]  ;;  %v107_v28 = vld [vmem:[%s3074_s1 + $0x18] sm:$0xff] }
   0x8   :  { %2389 = vmatprep.subr.bf16.mxu0 %v2388_v11  ;;  %2403 = vmatprep.subr.bf16.mxu1 %v2603_v10  ;;  %v108_v29 = vld [vmem:[%s3074_s1 + $0x20] sm:$0xff]  ;;  %v2396_v30 = vpack.c.bf16 %v98_v25, %v97_v24  ;;  %v2407_v31 = vpack.c.bf16 %v425_v27, %v424_v26  ;;  %v109_v32 = vld [vmem:[%s3074_s1 + $0x28] sm:$0xff]  ;;  %v110_v33 = vld [vmem:[%s3074_s1 + $0x30] sm:$0xff] }
   0x9   :  { %2167 = vmatmul.mubr.msk.f32.vlgmr.msra.gmra.mrb[0].mxu0 %vm114_vm0, %v105_v18  ;;  %v426_v34 = vld [vmem:[%s3073_s2 + $0x98] sm:$0xff]  ;;  %v99_v35 = vld [vmem:[%s3073_s2 + $0x50] sm:$0xff]  ;;  %v112_v37 = vld [vmem:[%s3074_s1 + $0x40] sm:$0xff] }
   0xa   :  { %2391 = vmatpush3.bf16.msra.mxu0 %v2388_v11  ;;  %2169 = vmatprep.mubr.msk.f32.mxu0 %vm114_vm0, %v106_v21  ;;  %v111_v36 = vld [vmem:[%s3074_s1 + $0x38] sm:$0xff]  ;;  %v113_v38 = vld [vmem:[%s3074_s1 + $0x48] sm:$0xff]  ;;  %v500_v41 = vld [vmem:[%s3073_s2] sm:$0xff] }
   0xb   :  { %2393 = vmatprep.subr.bf16.mxu0 %v2392_v22  ;;  %2405 = vmatpush3.bf16.msra.mxu1 %v2404_v23  ;;  %v501_v42 = vld [vmem:[%s3073_s2 + $0x8] sm:$0xff]  ;;  %v502_v46 = vld [vmem:[%s3073_s2 + $0x10] sm:$0xff]  ;;  %v503_v47 = vld [vmem:[%s3073_s2 + $0x18] sm:$0xff] }
   0xc   :  { %2406 = vmatprep.subr.bf16.mxu1 %v2603_v10  ;;  %v2742_v44 = vpack.c.bf16 %v501_v42, %v500_v41  ;;  %v2755_v50 = vpack.c.bf16 %v503_v47, %v502_v46  ;;  %v2786_v56 = vld [vmem:[%s3073_s2 + $0x120] sm:$0xff] }
   0xd   :  { %2170 = vmatmul.mubr.msk.f32.gmra.mrb[2].mxu0 %vm114_vm0, %v107_v28  ;;  %v2791_v58 = vrot.slane %v2786_v56, %v408_v54  ;;  %v16_v28 = vld [vmem:[%s3072_s0 + $0x10] sm:$0xff] }
   0xe   :  { %2395 = vmatpush3.bf16.msra.mxu0 %v2392_v22  ;;  %2172 = vmatprep.mubr.msk.f32.mxu0 %vm114_vm0, %v108_v29 }
   0xf   :  { %2397 = vmatprep.subr.bf16.mxu0 %v2396_v30  ;;  %2408 = vmatpush3.bf16.msra.mxu1 %v2407_v31 }
  0x10   :  { %2222 = vmatprep.subr.mxu1 %v2605_v14 }
  0x11   :  { %2173 = vmatmul.mubr.msk.f32.gmra.mrb[4].mxu0 %vm114_vm0, %v109_v32 }
  0x12   :  { %2399 = vmatpush3.bf16.msra.mxu0 %v2396_v30  ;;  %2175 = vmatprep.mubr.msk.f32.mxu0 %vm114_vm0, %v110_v33  ;;  %v17_v33 = vld [vmem:[%s3072_s0 + $0x18] sm:$0xff] }
  0x13   :  { %2223 = vmatpush3.msra.mxu1 %v426_v34  ;;  %2193 = vmatprep.subr.mxu0 %v99_v35 }
  0x14   :  { %2409 = vmatprep.subr.bf16.mxu1 %v2603_v10 }
  0x15   :  { %2176 = vmatmul.mubr.msk.f32.gmra.mrb[6].mxu0 %vm114_vm0, %v111_v36 }
  0x16   :  { %2178 = vmatprep.mubr.msk.f32.mxu0 %vm114_vm0, %v112_v37  ;;  %2194 = vmatpush3.msra.mxu0 %v99_v35 }
  0x17   :  { %2427 = vmatprep.subr.bf16.mxu0 %v2603_v10 }
  0x19   :  { %2179 = vmatmul.mubr.msk.f32.gmra.mrb[8].mxu0 %vm114_vm0, %v113_v38 }
  0x81   :  { %v59_v43 = vpop.permute.xlu0 %58  ;;  %v32_v45 = vpop.permute.xlu1 %31 }
  0x82   :  { %vm70_vm3 = vcmp.eq.s32.totalorder %v2734_v40, %v59_v43  ;;  %vm61_vm4 = vcmp.eq.s32.totalorder %v2734_v40, %v32_v45 }
  0x83   :  { %v2007_v48 = vsel %vm70_vm3, 1.0, %v2605_v14  ;;  %v1998_v51 = vsel %vm61_vm4, 1.0, %v2605_v14 }
  0x84   :  { %2225 = vmatmul.mubr.msk.f32.vlgmr.msra.gmra.mrb[0].mxu1 %vm260_vm2, %v2007_v48 }
  0x85   :  { %2411 = vmatpush3.bf16.msra.mxu1 %v2742_v44  ;;  %v29_v49 = vpop.permute.xlu0 %28  ;;  %2235 = vmatprep.mubr.msk.f32.mxu1 %vm2604_vm1, %v2605_v14 }
  0x86   :  { %vm60_vm5 = vcmp.eq.s32.totalorder %v2734_v40, %v29_v49  ;;  %2412 = vmatprep.subr.bf16.mxu1 %v2603_v10 }
  0x87   :  { %v1997_v52 = vsel %vm60_vm5, 1.0, %v2605_v14 }
  0x88   :  { %2195 = vmatprep.mubr.msk.f32.mxu0 %vm260_vm2, %v1997_v52 }
  0x89   :  { %2414 = vmatpush3.bf16.msra.mxu1 %v2755_v50  ;;  %2196 = vmatmul.mubr.msk.f32.vlgmr.msra.gmra.mrb[0].mxu0 %vm260_vm2, %v1998_v51 }
  0x8a   :  { %2415 = vmatprep.subr.bf16.mxu1 %v2603_v10  ;;  %2429 = vmatpush3.bf16.msra.mxu0 %v2742_v44 }
  0x8b   :  { %2430 = vmatprep.subr.bf16.mxu0 %v2603_v10 }
  0x8c   :  { %2236 = vmatmul.mubr.f32.vlgmr.msra.gmra.mrb[2].mxu1 %v2605_v14 }
  0x8d   :  { %2417 = vmatpush3.bf16.msra.mxu1 %v2742_v44  ;;  %2246 = vmatprep.mubr.msk.f32.mxu1 %vm2604_vm1, %v2605_v14 }
  0x8e   :  { %2418 = vmatprep.subr.bf16.mxu1 %v2603_v10  ;;  %2432 = vmatpush3.bf16.msra.mxu0 %v2755_v50 }
  0x8f   :  { %2439 = vmatprep.subr.bf16.mxu0 %v2603_v10 }
  0x91   :  { %2420 = vmatpush3.bf16.msra.mxu1 %v2755_v50 }
  0x92   :  { %2421 = vmatprep.subr.bf16.mxu1 %v2603_v10 }
 0x157   :  { %v2781_v55 = vpop.f32.mrb[0].mxu1 }
 0x158   :  { %v2226_v57 = vpop.f32.mrb[1].mxu1 }
 0x15c   :  { %v2197_v59 = vpop.f32.mrb[0].mxu0 }
 0x15d   :  { %v357_v60 = vpop.f32.mrb[1].mxu0  ;;  %v411_v17 = vadd.f32 %v2197_v59, %v2791_v58 }
 0x15e   :  { %v410_v61 = vadd.f32 %v2791_v58, %v357_v60 }
 0x15f   :  { %v574_v62 = vpop.f32.mrb[2].mxu1 }
 0x160   :  { %v578_v63 = vadd.f32 %v574_v62, %v410_v61  ;;  %v2237_v0 = vpop.f32.mrb[3].mxu1  ;;  %v18_v62 = vld [vmem:[%s3072_s0 + $0x20] sm:$0xff] }
 0x161   :  { %v22_v0 = vld [vmem:[%s3072_s0 + $0x40] sm:$0xff] }
 0x162   :  { %2512 = vtanh.f32 %v578_v63  ;;  %v2029_v2 = vmul.f32 -1.442695, %v578_v63  ;;  %v20_v63 = vld [vmem:[%s3072_s0 + $0x30] sm:$0xff] }
 0x164   :  { %2514 = vpow2.f32 %v2029_v2 }
 0x16c   :  { %v2513_v1 = vpop.eup %2512 }
 0x16d   :  { %588 = vrot.lane.b32.xlu1 %v2513_v1, %s2606_s25 }
 0x16e   :  { %v2515_v3 = vpop.eup %2514 }
 0x16f   :  { %v582_v4 = vadd.f32 1.0, %v2515_v3 }
 0x171   :  { %2516 = vrcp.f32 %v582_v4 }
 0x17b   :  { %v2517_v5 = vpop.eup %2516 }
 0x17c   :  { %v586_v8 = vmul.f32 0.0, %v2517_v5 }
 0x1df   :  { %v589_v6 = vpop.permute.xlu1 %588 }
 0x1e0   :  { %v591_v7 = vmul.f32 %v2517_v5, %v589_v6 }
 0x1e2   :  { %593 = vrot.lane.b32.xlu0 %v591_v7, %s2607_s26 }
 0x254   :  { %v594_v9 = vpop.permute.xlu0 %593 }
 0x255   :  { %v596_v11 = vadd.f32 %v594_v9, %v586_v8  ;;  %v21_v8 = vld [vmem:[%s3072_s0 + $0x38] sm:$0xff]  ;;  %v23_v9 = vld [vmem:[%s3072_s0 + $0x48] sm:$0xff] }
 0x257   :  { %2518 = vtanh.f32 %v596_v11 }
 0x261   :  { %v2519_v12 = vpop.eup %2518 }
 0x262   :  { %599 = vrot.lane.b32.xlu1 %v2519_v12, %s2606_s25 }
 0x2d4   :  { %v600_v13 = vpop.permute.xlu1 %599 }
 0x2d5   :  { %v602_v15 = vmul.f32 %v2517_v5, %v600_v13  ;;  %v19_v5 = vld [vmem:[%s3072_s0 + $0x28] sm:$0xff] }
 0x2d7   :  { %604 = vrot.lane.b32.xlu0 %v602_v15, %s2607_s26 }
 0x349   :  { %v605_v16 = vpop.permute.xlu0 %604 }
 0x34a   :  { %2247 = vmatmul.mubr.msk.f32.vlgmr.msra.gmra.mrb[4].mxu1 %vm504_vm6, %v605_v16 }
 0x34b   :  { %2423 = vmatpush3.bf16.msra.mxu1 %v2742_v44  ;;  %2257 = vmatprep.mubr.msk.f32.mxu1 %vm2604_vm1, %v2605_v14 }
 0x34c   :  { %2424 = vmatprep.subr.bf16.mxu1 %v2603_v10 }
 0x34f   :  { %2426 = vmatpush3.bf16.msra.mxu1 %v2755_v50 }
 0x350   :  { %2433 = vmatprep.subr.bf16.mxu1 %v2603_v10 }
 0x41d   :  { %v674_v18 = vpop.f32.mrb[4].mxu1 }
 0x41e   :  { %v678_v19 = vadd.f32 %v674_v18, %v411_v17  ;;  %v2248_v20 = vpop.f32.mrb[5].mxu1 }
 0x420   :  { %2520 = vtanh.f32 %v678_v19  ;;  %v2031_v22 = vmul.f32 -1.442695, %v678_v19 }
 0x422   :  { %2522 = vpow2.f32 %v2031_v22 }
 0x42a   :  { %v2521_v21 = vpop.eup %2520 }
 0x42b   :  { %688 = vrot.lane.b32.xlu1 %v2521_v21, %s2606_s25 }
 0x42c   :  { %v2523_v23 = vpop.eup %2522 }
 0x42d   :  { %v682_v24 = vadd.f32 1.0, %v2523_v23 }
 0x42f   :  { %2524 = vrcp.f32 %v682_v24 }
 0x439   :  { %v2525_v25 = vpop.eup %2524 }
 0x43a   :  { %v686_v29 = vmul.f32 %v2525_v25, %v596_v11 }
 0x49d   :  { %v689_v26 = vpop.permute.xlu1 %688 }
 0x49e   :  { %v691_v27 = vmul.f32 %v2525_v25, %v689_v26 }
 0x4a0   :  { %693 = vrot.lane.b32.xlu0 %v691_v27, %s2607_s26 }
 0x4a4   :  { %34 = vperm.xlu0 %2510, %v16_v28  }
 0x512   :  { %v694_v30 = vpop.permute.xlu0 %693 }
 0x513   :  { %v696_v31 = vadd.f32 %v694_v30, %v686_v29 }
 0x515   :  { %2526 = vtanh.f32 %v696_v31 }
 0x51f   :  { %v2527_v32 = vpop.eup %2526 }
 0x520   :  { %699 = vrot.lane.b32.xlu1 %v2527_v32, %s2606_s25 }
 0x523   :  { %v35_v34 = vpop.permute.xlu0 %34 }
 0x524   :  { %vm62_vm7 = vcmp.eq.s32.totalorder %v2734_v40, %v35_v34  ;;  %37 = vperm.xlu1 %2511, %v17_v33  }
 0x525   :  { %v1999_v35 = vsel %vm62_vm7, 1.0, %v2605_v14 }
 0x526   :  { %2198 = vmatprep.mubr.msk.f32.mxu0 %vm260_vm2, %v1999_v35 }
 0x592   :  { %v700_v36 = vpop.permute.xlu1 %699 }
 0x593   :  { %v702_v37 = vmul.f32 %v2525_v25, %v700_v36 }
 0x595   :  { %704 = vrot.lane.b32.xlu0 %v702_v37, %s2607_s26 }
 0x5a3   :  { %v38_v38 = vpop.permute.xlu1 %37 }
 0x5a4   :  { %vm63_vm8 = vcmp.eq.s32.totalorder %v2734_v40, %v38_v38 }
 0x5a5   :  { %v2000_v39 = vsel %vm63_vm8, 1.0, %v2605_v14 }
 0x5a6   :  { %2199 = vmatmul.mubr.msk.f32.gmra.mrb[2].mxu0 %vm260_vm2, %v2000_v39 }
 0x607   :  { %v705_v41 = vpop.permute.xlu0 %704 }
 0x608   :  { %2258 = vmatmul.mubr.msk.f32.vlgmr.msra.gmra.mrb[6].mxu1 %vm504_vm6, %v705_v41 }
 0x609   :  { %2435 = vmatpush3.bf16.msra.mxu1 %v2742_v44  ;;  %2279 = vmatprep.mubr.msk.f32.mxu1 %vm2604_vm1, %v2605_v14 }
 0x60a   :  { %2436 = vmatprep.subr.bf16.mxu1 %v2603_v10 }
 0x60d   :  { %2438 = vmatpush3.bf16.msra.mxu1 %v2755_v50 }
 0x60e   :  { %2445 = vmatprep.subr.bf16.mxu1 %v2603_v10 }
 0x679   :  { %v2829_v42 = vpop.f32.mrb[2].mxu0 }
 0x67a   :  { %v367_v43 = vpop.f32.mrb[3].mxu0  ;;  %v413_v30 = vadd.f32 %v2829_v42, %v2791_v58 }
 0x67b   :  { %v412_v45 = vadd.f32 %v2791_v58, %v367_v43 }
 0x6db   :  { %v774_v46 = vpop.f32.mrb[6].mxu1 }
 0x6dc   :  { %v778_v47 = vadd.f32 %v774_v46, %v412_v45  ;;  %v2259_v48 = vpop.f32.mrb[7].mxu1 }
 0x6de   :  { %2528 = vtanh.f32 %v778_v47  ;;  %v2033_v51 = vmul.f32 -1.442695, %v778_v47 }
 0x6e0   :  { %2530 = vpow2.f32 %v2033_v51 }
 0x6e8   :  { %v2529_v49 = vpop.eup %2528 }
 0x6e9   :  { %788 = vrot.lane.b32.xlu1 %v2529_v49, %s2606_s25 }
 0x6ea   :  { %v2531_v52 = vpop.eup %2530 }
 0x6eb   :  { %v782_v57 = vadd.f32 1.0, %v2531_v52 }
 0x6ed   :  { %2532 = vrcp.f32 %v782_v57 }
 0x6f7   :  { %v2533_v59 = vpop.eup %2532 }
 0x6f8   :  { %v786_v1 = vmul.f32 %v2533_v59, %v696_v31 }
 0x75b   :  { %v789_v60 = vpop.permute.xlu1 %788 }
 0x75c   :  { %v791_v61 = vmul.f32 %v2533_v59, %v789_v60 }
 0x75e   :  { %793 = vrot.lane.b32.xlu0 %v791_v61, %s2607_s26 }
 0x762   :  { %40 = vperm.xlu0 %2510, %v18_v62  }
 0x766   :  { %46 = vperm.xlu0 %2510, %v20_v63  }
 0x76a   :  { %52 = vperm.xlu0 %2510, %v22_v0  }
 0x7d0   :  { %v794_v2 = vpop.permute.xlu0 %793 }
 0x7d1   :  { %v2843_v3 = vadd.f32 %v794_v2, %v786_v1 }
 0x7d3   :  { %2534 = vtanh.f32 %v2843_v3 }
 0x7dd   :  { %v2535_v4 = vpop.eup %2534 }
 0x7de   :  { %799 = vrot.lane.b32.xlu1 %v2535_v4, %s2606_s25 }
 0x7e1   :  { %v41_v6 = vpop.permute.xlu0 %40 }
 0x7e2   :  { %vm64_vm9 = vcmp.eq.s32.totalorder %v2734_v40, %v41_v6  ;;  %43 = vperm.xlu1 %2511, %v19_v5  }
 0x7e3   :  { %v2001_v7 = vsel %vm64_vm9, 1.0, %v2605_v14 }
 0x7e4   :  { %2201 = vmatprep.mubr.msk.f32.mxu0 %vm260_vm2, %v2001_v7 }
 0x7e5   :  { %v47_v13 = vpop.permute.xlu0 %46 }
 0x7e6   :  { %49 = vperm.xlu1 %2511, %v21_v8   ;;  %vm66_vm10 = vcmp.eq.s32.totalorder %v2734_v40, %v47_v13 }
 0x7e7   :  { %v2003_v18 = vsel %vm66_vm10, 1.0, %v2605_v14 }
 0x7e9   :  { %v53_v16 = vpop.permute.xlu0 %52 }
 0x7ea   :  { %55 = vperm.xlu1 %2511, %v23_v9   ;;  %vm68_vm12 = vcmp.eq.s32.totalorder %v2734_v40, %v53_v16 }
 0x7eb   :  { %v2005_v21 = vsel %vm68_vm12, 1.0, %v2605_v14 }
 0x850   :  { %v800_v11 = vpop.permute.xlu1 %799 }
 0x851   :  { %v802_v12 = vmul.f32 %v2533_v59, %v800_v11 }
 0x853   :  { %804 = vrot.lane.b32.xlu0 %v802_v12, %s2607_s26 }
 0x861   :  { %v44_v15 = vpop.permute.xlu1 %43 }
 0x862   :  { %vm65_vm11 = vcmp.eq.s32.totalorder %v2734_v40, %v44_v15 }
 0x863   :  { %v2002_v17 = vsel %vm65_vm11, 1.0, %v2605_v14 }
 0x864   :  { %2202 = vmatmul.mubr.msk.f32.gmra.mrb[4].mxu0 %vm260_vm2, %v2002_v17 }
 0x865   :  { %2204 = vmatprep.mubr.msk.f32.mxu0 %vm260_vm2, %v2003_v18  ;;  %v50_v19 = vpop.permute.xlu1 %49 }
 0x866   :  { %vm67_vm13 = vcmp.eq.s32.totalorder %v2734_v40, %v50_v19 }
 0x867   :  { %v2004_v20 = vsel %vm67_vm13, 1.0, %v2605_v14 }
 0x868   :  { %2205 = vmatmul.mubr.msk.f32.gmra.mrb[6].mxu0 %vm260_vm2, %v2004_v20 }
 0x869   :  { %2207 = vmatprep.mubr.msk.f32.mxu0 %vm260_vm2, %v2005_v21  ;;  %v56_v22 = vpop.permute.xlu1 %55 }
 0x86a   :  { %vm69_vm14 = vcmp.eq.s32.totalorder %v2734_v40, %v56_v22 }
 0x86b   :  { %v2006_v23 = vsel %vm69_vm14, 1.0, %v2605_v14 }
 0x86c   :  { %2208 = vmatmul.mubr.msk.f32.gmra.mrb[8].mxu0 %vm260_vm2, %v2006_v23 }
 0x86d   :  { %2268 = vmatprep.mubr.msk.f32.mxu0 %vm2604_vm1, %v2605_v14 }
 0x8c5   :  { %v805_v24 = vpop.permute.xlu0 %804 }
 0x8c6   :  { %2269 = vmatmul.mubr.msk.f32.vlgmr.msra.gmra.mrb[10].mxu0 %vm504_vm6, %v805_v24 }
 0x8c7   :  { %2441 = vmatpush3.bf16.msra.mxu0 %v2742_v44  ;;  %2290 = vmatprep.mubr.msk.f32.mxu0 %vm2604_vm1, %v2605_v14 }
 0x8c8   :  { %2442 = vmatprep.subr.bf16.mxu0 %v2603_v10 }
 0x8cb   :  { %2444 = vmatpush3.bf16.msra.mxu0 %v2755_v50 }
 0x8cc   :  { %2451 = vmatprep.subr.bf16.mxu0 %v2603_v10 }
 0x937   :  { %v2884_v40 = vpop.f32.mrb[4].mxu0 }
 0x938   :  { %v377_v25 = vpop.f32.mrb[5].mxu0  ;;  %v415_v11 = vadd.f32 %v2884_v40, %v2791_v58 }
 0x939   :  { %v414_v51 = vadd.f32 %v2791_v58, %v377_v25 }
 0x93b   :  { %v2886_v26 = vpop.f32.mrb[6].mxu0 }
 0x93c   :  { %v2888_v27 = vpop.f32.mrb[7].mxu0 }
 0x93f   :  { %v2890_v28 = vpop.f32.mrb[8].mxu0 }
 0x940   :  { %v2892_v29 = vpop.f32.mrb[9].mxu0 }
 0x999   :  { %v874_v31 = vpop.f32.mrb[10].mxu0 }
 0x99a   :  { %v878_v32 = vadd.f32 %v874_v31, %v413_v30  ;;  %v2270_v33 = vpop.f32.mrb[11].mxu0 }
 0x99b   :  { %v416_v33 = vadd.f32 %v2791_v58, %v2888_v27 }
 0x99c   :  { %2536 = vtanh.f32 %v878_v32  ;;  %v2035_v35 = vmul.f32 -1.442695, %v878_v32 }
 0x99e   :  { %2538 = vpow2.f32 %v2035_v35 }
 0x9a6   :  { %v2537_v34 = vpop.eup %2536 }
 0x9a7   :  { %888 = vrot.lane.b32.xlu1 %v2537_v34, %s2606_s25 }
 0x9a8   :  { %v2539_v36 = vpop.eup %2538 }
 0x9a9   :  { %v882_v37 = vadd.f32 1.0, %v2539_v36 }
 0x9ab   :  { %2540 = vrcp.f32 %v882_v37 }
 0x9b5   :  { %v2541_v38 = vpop.eup %2540 }
 0x9b6   :  { %v886_v43 = vmul.f32 %v2541_v38, %v2843_v3 }
 0xa19   :  { %v889_v39 = vpop.permute.xlu1 %888 }
 0xa1a   :  { %v891_v41 = vmul.f32 %v2541_v38, %v889_v39 }
 0xa1c   :  { %893 = vrot.lane.b32.xlu0 %v891_v41, %s2607_s26 }
 0xa8e   :  { %v894_v42 = vpop.permute.xlu0 %893 }
 0xa8f   :  { %v896_v45 = vadd.f32 %v894_v42, %v886_v43 }
 0xa91   :  { %2542 = vtanh.f32 %v896_v45 }
 0xa9b   :  { %v2543_v46 = vpop.eup %2542 }
 0xa9c   :  { %899 = vrot.lane.b32.xlu1 %v2543_v46, %s2606_s25 }
 0xb0e   :  { %v900_v47 = vpop.permute.xlu1 %899 }
 0xb0f   :  { %v902_v48 = vmul.f32 %v2541_v38, %v900_v47 }
 0xb11   :  { %904 = vrot.lane.b32.xlu0 %v902_v48, %s2607_s26 }
 0xb83   :  { %v905_v49 = vpop.permute.xlu0 %904 }
 0xb84   :  { %2280 = vmatmul.mubr.msk.f32.vlgmr.msra.gmra.mrb[8].mxu1 %vm504_vm6, %v905_v49 }
 0xb85   :  { %2447 = vmatpush3.bf16.msra.mxu1 %v2742_v44  ;;  %2301 = vmatprep.mubr.msk.f32.mxu1 %vm2604_vm1, %v2605_v14 }
 0xb86   :  { %2448 = vmatprep.subr.bf16.mxu1 %v2603_v10 }
 0xb89   :  { %2450 = vmatpush3.bf16.msra.mxu1 %v2755_v50 }
 0xb8a   :  { %2457 = vmatprep.subr.bf16.mxu1 %v2603_v10 }
 0xc57   :  { %v974_v52 = vpop.f32.mrb[8].mxu1 }
 0xc58   :  { %v978_v57 = vadd.f32 %v974_v52, %v414_v51  ;;  %v2281_v59 = vpop.f32.mrb[9].mxu1 }
 0xc5a   :  { %2544 = vtanh.f32 %v978_v57  ;;  %v2037_v61 = vmul.f32 -1.442695, %v978_v57  ;;  %v417_v57 = vadd.f32 %v2886_v26, %v2791_v58 }
 0xc5c   :  { %2546 = vpow2.f32 %v2037_v61 }
 0xc64   :  { %v2545_v60 = vpop.eup %2544 }
 0xc65   :  { %988 = vrot.lane.b32.xlu1 %v2545_v60, %s2606_s25 }
 0xc66   :  { %v2547_v62 = vpop.eup %2546 }
 0xc67   :  { %v982_v63 = vadd.f32 1.0, %v2547_v62 }
 0xc69   :  { %2548 = vrcp.f32 %v982_v63 }
 0xc73   :  { %v2549_v0 = vpop.eup %2548 }
 0xc74   :  { %v986_v3 = vmul.f32 %v2549_v0, %v896_v45 }
 0xcd7   :  { %v989_v1 = vpop.permute.xlu1 %988 }
 0xcd8   :  { %v991_v2 = vmul.f32 %v2549_v0, %v989_v1 }
 0xcda   :  { %993 = vrot.lane.b32.xlu0 %v991_v2, %s2607_s26 }
 0xd4c   :  { %v994_v4 = vpop.permute.xlu0 %993 }
 0xd4d   :  { %v996_v5 = vadd.f32 %v994_v4, %v986_v3 }
 0xd4f   :  { %2550 = vtanh.f32 %v996_v5 }
 0xd59   :  { %v2551_v6 = vpop.eup %2550 }
 0xd5a   :  { %999 = vrot.lane.b32.xlu1 %v2551_v6, %s2606_s25 }
 0xdcc   :  { %v1000_v7 = vpop.permute.xlu1 %999 }
 0xdcd   :  { %v1002_v8 = vmul.f32 %v2549_v0, %v1000_v7 }
 0xdcf   :  { %1004 = vrot.lane.b32.xlu0 %v1002_v8, %s2607_s26 }
 0xe41   :  { %v1005_v9 = vpop.permute.xlu0 %1004 }
 0xe42   :  { %2291 = vmatmul.mubr.msk.f32.vlgmr.msra.gmra.mrb[12].mxu0 %vm504_vm6, %v1005_v9  ;;  %v418_v9 = vadd.f32 %v2791_v58, %v2892_v29 }
 0xe43   :  { %2453 = vmatpush3.bf16.msra.mxu0 %v2742_v44  ;;  %2312 = vmatprep.mubr.msk.f32.mxu0 %vm2604_vm1, %v2605_v14 }
 0xe44   :  { %2454 = vmatprep.subr.bf16.mxu0 %v2603_v10 }
 0xe47   :  { %2456 = vmatpush3.bf16.msra.mxu0 %v2755_v50 }
 0xe48   :  { %2463 = vmatprep.subr.bf16.mxu0 %v2603_v10 }
 0xf15   :  { %v1074_v12 = vpop.f32.mrb[12].mxu0 }
 0xf16   :  { %v1078_v13 = vadd.f32 %v1074_v12, %v415_v11  ;;  %v2292_v15 = vpop.f32.mrb[13].mxu0 }
 0xf18   :  { %2552 = vtanh.f32 %v1078_v13  ;;  %v2039_v17 = vmul.f32 -1.442695, %v1078_v13 }
 0xf1a   :  { %2554 = vpow2.f32 %v2039_v17 }
 0xf22   :  { %v2553_v16 = vpop.eup %2552 }
 0xf23   :  { %1088 = vrot.lane.b32.xlu1 %v2553_v16, %s2606_s25 }
 0xf24   :  { %v2555_v18 = vpop.eup %2554 }
 0xf25   :  { %v1082_v19 = vadd.f32 1.0, %v2555_v18 }
 0xf27   :  { %2556 = vrcp.f32 %v1082_v19 }
 0xf31   :  { %v2557_v20 = vpop.eup %2556 }
 0xf32   :  { %v1086_v23 = vmul.f32 %v2557_v20, %v996_v5 }
 0xf95   :  { %v1089_v21 = vpop.permute.xlu1 %1088 }
 0xf96   :  { %v1091_v22 = vmul.f32 %v2557_v20, %v1089_v21 }
 0xf98   :  { %1093 = vrot.lane.b32.xlu0 %v1091_v22, %s2607_s26 }
0x100a   :  { %v1094_v24 = vpop.permute.xlu0 %1093 }
0x100b   :  { %v1096_v40 = vadd.f32 %v1094_v24, %v1086_v23 }
0x100d   :  { %2558 = vtanh.f32 %v1096_v40 }
0x1017   :  { %v2559_v25 = vpop.eup %2558 }
0x1018   :  { %1099 = vrot.lane.b32.xlu1 %v2559_v25, %s2606_s25 }
0x108a   :  { %v1100_v30 = vpop.permute.xlu1 %1099 }
0x108b   :  { %v1102_v31 = vmul.f32 %v2557_v20, %v1100_v30 }
0x108d   :  { %1104 = vrot.lane.b32.xlu0 %v1102_v31, %s2607_s26  ;;  %v419_v31 = vadd.f32 %v2890_v28, %v2791_v58  ;;  %v1507_v58 = vld [vmem:[%s3073_s2 + $0xc0] sm:$0xff]  ;;  %v1508_v28 = vld [vmem:[%s3073_s2 + $0xc8] sm:$0xff] }
0x10ff   :  { %v1105_v32 = vpop.permute.xlu0 %1104 }
0x1100   :  { %2302 = vmatmul.mubr.msk.f32.vlgmr.msra.gmra.mrb[10].mxu1 %vm504_vm6, %v1105_v32 }
0x1101   :  { %2459 = vmatpush3.bf16.msra.mxu1 %v2742_v44  ;;  %2323 = vmatprep.mubr.msk.f32.mxu1 %vm2604_vm1, %v2605_v14 }
0x1102   :  { %2460 = vmatprep.subr.bf16.mxu1 %v2603_v10 }
0x1105   :  { %2462 = vmatpush3.bf16.msra.mxu1 %v2755_v50 }
0x1106   :  { %2469 = vmatprep.subr.bf16.mxu1 %v2603_v10 }
0x11d3   :  { %v1174_v34 = vpop.f32.mrb[10].mxu1 }
0x11d4   :  { %v1178_v35 = vadd.f32 %v1174_v34, %v416_v33  ;;  %v2303_v36 = vpop.f32.mrb[11].mxu1 }
0x11d6   :  { %2560 = vtanh.f32 %v1178_v35  ;;  %v2041_v38 = vmul.f32 -1.442695, %v1178_v35 }
0x11d8   :  { %2562 = vpow2.f32 %v2041_v38 }
0x11e0   :  { %v2561_v37 = vpop.eup %2560 }
0x11e1   :  { %1188 = vrot.lane.b32.xlu1 %v2561_v37, %s2606_s25 }
0x11e2   :  { %v2563_v39 = vpop.eup %2562 }
0x11e3   :  { %v1182_v41 = vadd.f32 1.0, %v2563_v39 }
0x11e5   :  { %2564 = vrcp.f32 %v1182_v41 }
0x11ef   :  { %v2565_v43 = vpop.eup %2564 }
0x11f0   :  { %v1186_v46 = vmul.f32 %v2565_v43, %v1096_v40 }
0x1253   :  { %v1189_v42 = vpop.permute.xlu1 %1188 }
0x1254   :  { %v1191_v45 = vmul.f32 %v2565_v43, %v1189_v42  ;;  %v1509_v42 = vld [vmem:[%s3073_s2 + $0xd0] sm:$0xff] }
0x1256   :  { %1193 = vrot.lane.b32.xlu0 %v1191_v45, %s2607_s26  ;;  %v2470_v45 = vpack.c.bf16 %v1508_v28, %v1507_v58 }
0x12c8   :  { %v1194_v47 = vpop.permute.xlu0 %1193 }
0x12c9   :  { %v1196_v27 = vadd.f32 %v1194_v47, %v1186_v46  ;;  %v1510_v46 = vld [vmem:[%s3073_s2 + $0xd8] sm:$0xff] }
0x12ca   :  { %v2473_v47 = vpack.c.bf16 %v1510_v46, %v1509_v42  ;;  %v1799_v46 = vld [vmem:[%s3073_s2 + $0x108] sm:$0xff] }
0x12cb   :  { %2566 = vtanh.f32 %v1196_v27 }
0x12d5   :  { %v2567_v48 = vpop.eup %2566 }
0x12d6   :  { %1199 = vrot.lane.b32.xlu1 %v2567_v48, %s2606_s25 }
0x1348   :  { %v1200_v49 = vpop.permute.xlu1 %1199 }
0x1349   :  { %v1202_v51 = vmul.f32 %v2565_v43, %v1200_v49 }
0x134b   :  { %1204 = vrot.lane.b32.xlu0 %v1202_v51, %s2607_s26  ;;  %v1503_v51 = vld [vmem:[%s3073_s2 + $0xa0] sm:$0xff] }
0x13bd   :  { %v1205_v52 = vpop.permute.xlu0 %1204 }
0x13be   :  { %2313 = vmatmul.mubr.msk.f32.vlgmr.msra.gmra.mrb[14].mxu0 %vm504_vm6, %v1205_v52  ;;  %v1504_v52 = vld [vmem:[%s3073_s2 + $0xa8] sm:$0xff] }
0x13bf   :  { %2465 = vmatpush3.bf16.msra.mxu0 %v2742_v44  ;;  %2334 = vmatprep.mubr.msk.f32.mxu0 %vm2604_vm1, %v2605_v14 }
0x13c0   :  { %2466 = vmatprep.subr.bf16.mxu0 %v2603_v10 }
0x13c3   :  { %2468 = vmatpush3.bf16.msra.mxu0 %v2755_v50 }
0x13c4   :  { %2475 = vmatprep.subr.bf16.mxu0 %v2603_v10 }
0x1491   :  { %v1274_v59 = vpop.f32.mrb[14].mxu0 }
0x1492   :  { %v1278_v60 = vadd.f32 %v1274_v59, %v417_v57  ;;  %v2314_v61 = vpop.f32.mrb[15].mxu0  ;;  %v1505_v57 = vld [vmem:[%s3073_s2 + $0xb0] sm:$0xff]  ;;  %v2476_v59 = vpack.c.bf16 %v1504_v52, %v1503_v51  ;;  %v1789_v51 = vsub.s32 5, %v2778_v53  ;;  %v1794_v52 = vsub.s32 6, %v2778_v53 }
0x1494   :  { %2568 = vtanh.f32 %v1278_v60  ;;  %v2043_v44 = vmul.f32 -1.442695, %v1278_v60  ;;  %v1506_v60 = vld [vmem:[%s3073_s2 + $0xb8] sm:$0xff] }
0x1495   :  { %v2479_v61 = vpack.c.bf16 %v1506_v60, %v1505_v57  ;;  %v1790_v57 = vrot.slane %v2786_v56, %v1789_v51 }
0x1496   :  { %2570 = vpow2.f32 %v2043_v44 }
0x149e   :  { %v2569_v62 = vpop.eup %2568 }
0x149f   :  { %1288 = vrot.lane.b32.xlu1 %v2569_v62, %s2606_s25 }
0x14a0   :  { %v2571_v63 = vpop.eup %2570 }
0x14a1   :  { %v1282_v0 = vadd.f32 1.0, %v2571_v63 }
0x14a3   :  { %2572 = vrcp.f32 %v1282_v0 }
0x14ad   :  { %v2573_v1 = vpop.eup %2572 }
0x14ae   :  { %v1286_v3 = vmul.f32 %v2573_v1, %v1196_v27 }
0x1511   :  { %v1289_v2 = vpop.permute.xlu1 %1288 }
0x1512   :  { %v1291_v50 = vmul.f32 %v2573_v1, %v1289_v2 }
0x1514   :  { %1293 = vrot.lane.b32.xlu0 %v1291_v50, %s2607_s26 }
0x1586   :  { %v1294_v4 = vpop.permute.xlu0 %1293 }
0x1587   :  { %v1296_v26 = vadd.f32 %v1294_v4, %v1286_v3  ;;  %v1663_v3 = vsub.s32 1, %v2778_v53 }
0x1589   :  { %2574 = vtanh.f32 %v1296_v26  ;;  %v1664_v4 = vrot.slane %v2786_v56, %v1663_v3 }
0x1593   :  { %v2575_v5 = vpop.eup %2574 }
0x1594   :  { %1299 = vrot.lane.b32.xlu1 %v2575_v5, %s2606_s25 }
0x1606   :  { %v1300_v6 = vpop.permute.xlu1 %1299 }
0x1607   :  { %v1302_v7 = vmul.f32 %v2573_v1, %v1300_v6 }
0x1609   :  { %1304 = vrot.lane.b32.xlu0 %v1302_v7, %s2607_s26 }
0x167b   :  { %v1305_v8 = vpop.permute.xlu0 %1304 }
0x167c   :  { %2324 = vmatmul.mubr.msk.f32.vlgmr.msra.gmra.mrb[12].mxu1 %vm504_vm6, %v1305_v8 }
0x167d   :  { %2345 = vmatprep.mubr.msk.f32.mxu1 %vm2604_vm1, %v2605_v14  ;;  %2471 = vmatpush3.bf16.msra.mxu1 %v2470_v45 }
0x167e   :  { %2472 = vmatprep.subr.bf16.mxu1 %v2603_v10 }
0x1681   :  { %2474 = vmatpush3.bf16.msra.mxu1 %v2473_v47 }
0x1682   :  { %2481 = vmatprep.subr.bf16.mxu1 %v2603_v10 }
0x174f   :  { %v1374_v11 = vpop.f32.mrb[12].mxu1 }
0x1750   :  { %v1378_v12 = vadd.f32 %v1374_v11, %v418_v9  ;;  %v2325_v13 = vpop.f32.mrb[13].mxu1 }
0x1752   :  { %2576 = vtanh.f32 %v1378_v12  ;;  %v2045_v16 = vmul.f32 -1.442695, %v1378_v12 }
0x1754   :  { %2578 = vpow2.f32 %v2045_v16  ;;  %v1691_v16 = vld [vmem:[%s3073_s2 + $0xe0] sm:$0xff] }
0x175c   :  { %v2577_v15 = vpop.eup %2576 }
0x175d   :  { %1388 = vrot.lane.b32.xlu1 %v2577_v15, %s2606_s25 }
0x175e   :  { %v2579_v17 = vpop.eup %2578 }
0x175f   :  { %v1382_v18 = vadd.f32 1.0, %v2579_v17  ;;  %v1692_v17 = vld [vmem:[%s3073_s2 + $0xe8] sm:$0xff] }
0x1761   :  { %2580 = vrcp.f32 %v1382_v18  ;;  %v2482_v18 = vpack.c.bf16 %v1692_v17, %v1691_v16  ;;  %v103_v17 = vld [vmem:[%s3073_s2 + $0x128] sm:$0xff] }
0x176b   :  { %v2581_v19 = vpop.eup %2580 }
0x176c   :  { %v1386_v22 = vmul.f32 %v2581_v19, %v1296_v26 }
0x17cf   :  { %v1389_v20 = vpop.permute.xlu1 %1388 }
0x17d0   :  { %v1391_v21 = vmul.f32 %v2581_v19, %v1389_v20  ;;  %v1694_v20 = vld [vmem:[%s3073_s2 + $0xf8] sm:$0xff] }
0x17d2   :  { %1393 = vrot.lane.b32.xlu0 %v1391_v21, %s2607_s26 }
0x1844   :  { %v1394_v23 = vpop.permute.xlu0 %1393 }
0x1845   :  { %v1396_v29 = vadd.f32 %v1394_v23, %v1386_v22 }
0x1847   :  { %2582 = vtanh.f32 %v1396_v29 }
0x1851   :  { %v2583_v24 = vpop.eup %2582 }
0x1852   :  { %1399 = vrot.lane.b32.xlu1 %v2583_v24, %s2606_s25  ;;  %v1682_v24 = vsub.s32 2, %v2778_v53 }
0x18c4   :  { %v1400_v40 = vpop.permute.xlu1 %1399 }
0x18c5   :  { %v1402_v25 = vmul.f32 %v2581_v19, %v1400_v40  ;;  %v1693_v19 = vld [vmem:[%s3073_s2 + $0xf0] sm:$0xff]  ;;  %v1687_v40 = vsub.s32 3, %v2778_v53 }
0x18c6   :  { %v2485_v21 = vpack.c.bf16 %v1694_v20, %v1693_v19  ;;  %v1900_v20 = vrot.slane %v103_v17, %v1663_v3 }
0x18c7   :  { %1404 = vrot.lane.b32.xlu0 %v1402_v25, %s2607_s26  ;;  %v1683_v25 = vrot.slane %v2786_v56, %v1682_v24 }
0x1939   :  { %v1405_v30 = vpop.permute.xlu0 %1404 }
0x193a   :  { %2335 = vmatmul.mubr.msk.f32.vlgmr.msra.gmra.mrb[16].mxu0 %vm504_vm6, %v1405_v30 }
0x193b   :  { %2356 = vmatprep.mubr.msk.f32.mxu0 %vm2604_vm1, %v2605_v14  ;;  %2477 = vmatpush3.bf16.msra.mxu0 %v2476_v59 }
0x193c   :  { %2478 = vmatprep.subr.bf16.mxu0 %v2603_v10 }
0x193f   :  { %2480 = vmatpush3.bf16.msra.mxu0 %v2479_v61  ;;  %v1795_v61 = vrot.slane %v2786_v56, %v1794_v52 }
0x1940   :  { %2487 = vmatprep.subr.bf16.mxu0 %v2603_v10 }
0x1a0d   :  { %v1474_v32 = vpop.f32.mrb[16].mxu0 }
0x1a0e   :  { %v1478_v33 = vadd.f32 %v1474_v32, %v419_v31  ;;  %v2336_v34 = vpop.f32.mrb[17].mxu0  ;;  %v1688_v32 = vrot.slane %v2786_v56, %v1687_v40  ;;  %v1981_v40 = vrot.slane %v103_v17, %v1682_v24 }
0x1a10   :  { %2584 = vtanh.f32 %v1478_v33  ;;  %v2047_v36 = vmul.f32 -1.442695, %v1478_v33 }
0x1a12   :  { %2586 = vpow2.f32 %v2047_v36 }
0x1a1a   :  { %v2585_v35 = vpop.eup %2584 }
0x1a1b   :  { %1488 = vrot.lane.b32.xlu1 %v2585_v35, %s2606_s25 }
0x1a1c   :  { %v2587_v37 = vpop.eup %2586 }
0x1a1d   :  { %v1482_v38 = vadd.f32 1.0, %v2587_v37 }
0x1a1f   :  { %2588 = vrcp.f32 %v1482_v38 }
0x1a29   :  { %v2589_v39 = vpop.eup %2588 }
0x1a2a   :  { %v1486_v27 = vmul.f32 %v2589_v39, %v1396_v29 }
0x1a8d   :  { %v1489_v41 = vpop.permute.xlu1 %1488 }
0x1a8e   :  { %v1491_v43 = vmul.f32 %v2589_v39, %v1489_v41 }
0x1a90   :  { %1493 = vrot.lane.b32.xlu0 %v1491_v43, %s2607_s26 }
0x1b02   :  { %v1494_v48 = vpop.permute.xlu0 %1493 }
0x1b03   :  { %v1496_v49 = vadd.f32 %v1494_v48, %v1486_v27 }
0x1b05   :  { %2590 = vtanh.f32 %v1496_v49  ;;  %1512 = vrot.lane.b32.xlu0 %v1496_v49, %s2608_s22 }
0x1b0f   :  { %v2591_v62 = vpop.eup %2590 }
0x1b10   :  { %1499 = vrot.lane.b32.xlu1 %v2591_v62, %s2606_s25 }
0x1b77   :  { %v1513_v44 = vpop.permute.xlu0 %1512 }
0x1b78   :  { %2346 = vmatmul.mubr.msk.f32.vlgmr.msra.gmra.mrb[14].mxu1 %vm504_vm6, %v1513_v44 }
0x1b79   :  { %2367 = vmatprep.mubr.msk.f32.mxu1 %vm2604_vm1, %v2605_v14  ;;  %2483 = vmatpush3.bf16.msra.mxu1 %v2482_v18  ;;  %v1895_v18 = vrot.slane %v103_v17, %v408_v54 }
0x1b7a   :  { %2484 = vmatprep.subr.bf16.mxu1 %v2603_v10 }
0x1b7d   :  { %2486 = vmatpush3.bf16.msra.mxu1 %v2485_v21 }
0x1b7e   :  { %2490 = vmatprep.subr.bf16.mxu1 %v2603_v10  ;;  %v1770_v10 = vsub.s32 4, %v2778_v53 }
0x1b80   :  { %v1771_v36 = vrot.slane %v2786_v56, %v1770_v10 }
0x1b82   :  { %v1500_v63 = vpop.permute.xlu1 %1499 }
0x1b83   :  { %v1502_v0 = vmul.f32 %v2589_v39, %v1500_v63 }
0x1b85   :  { %1587 = vrot.lane.b32.xlu1 %v1502_v0, %s2607_s26  ;;  %v1876_v0 = vsub.s32 7, %v2778_v53 }
0x1bf7   :  { %v1588_v1 = vpop.permute.xlu1 %1587 }
0x1bf8   :  { %2357 = vmatmul.mubr.msk.f32.vlgmr.msra.gmra.mrb[18].mxu0 %vm504_vm6, %v1588_v1  ;;  %v1877_v1 = vrot.slane %v2786_v56, %v1876_v0 }
0x1bf9   :  { %2374 = vmatprep.mubr.msk.f32.mxu0 %vm2604_vm1, %v2605_v14 }
0x1c4b   :  { %v1582_v2 = vpop.f32.mrb[14].mxu1 }
0x1c4c   :  { %v2347_v50 = vpop.f32.mrb[15].mxu1 }
0x1ccb   :  { %v1657_v26 = vpop.f32.mrb[18].mxu0 }
0x1ccc   :  { %v1658_v5 = vadd.f32 %v1657_v26, %v1582_v2  ;;  %v2358_v6 = vpop.f32.mrb[19].mxu0 }
0x1cce   :  { %v1665_v7 = vadd.f32 %v1664_v4, %v1658_v5 }
0x1cd0   :  { %v1666_v8 = vsel %vm504_vm6, %v1665_v7, 0.0 }
0x1cd1   :  { %1667 = vadd.xlane.f32.xlu0 %v1666_v8 }
0x1d5e   :  { %v1668_v9 = vpop.xlane.xlu0 %1667 }
0x1d5f   :  { %v1670_v11 = vmul.f32 0.03125, %v1668_v9 }
0x1d61   :  { %v1671_v12 = vsub.f32 %v1665_v7, %v1670_v11 }
0x1d63   :  { %v1672_v13 = vmul.f32 %v1671_v12, %v1671_v12 }
0x1d65   :  { %v1673_v15 = vsel %vm504_vm6, %v1672_v13, 0.0 }
0x1d66   :  { %1674 = vadd.xlane.f32.xlu1 %v1673_v15 }
0x1df3   :  { %v1675_v22 = vpop.xlane.xlu1 %1674 }
0x1df4   :  { %v1676_v23 = vmul.f32 0.03125, %v1675_v22 }
0x1df6   :  { %v1677_v29 = vadd.f32 1e-05, %v1676_v23 }
0x1df8   :  { %2592 = vrsqrt.f32 %v1677_v29 }
0x1e02   :  { %v2593_v30 = vpop.eup %2592 }
0x1e03   :  { %v1679_v31 = vmul.f32 %v2593_v30, %v1671_v12  ;;  %v1903_v12 = vld [vmem:[%s3073_s2 + $0x110] sm:$0xff] }
0x1e05   :  { %v1684_v33 = vmul.f32 %v1683_v25, %v1679_v31 }
0x1e07   :  { %v1689_v34 = vadd.f32 %v1688_v32, %v1684_v33 }
0x1e09   :  { %v1690_v35 = vmax.f32 %v1689_v34, 0.0 }
0x1e0b   :  { %2368 = vmatmul.mubr.msk.f32.vlgmr.msra.gmra.mrb[16].mxu1 %vm504_vm6, %v1690_v35 }
0x1e0c   :  { %2381 = vmatprep.mubr.msk.f32.mxu1 %vm2604_vm1, %v2605_v14  ;;  %v1798_v14 = vld [vmem:[%s3073_s2 + $0x100] sm:$0xff] }
0x1e0d   :  { %v2488_v47 = vpack.c.bf16 %v1799_v46, %v1798_v14 }
0x1e0f   :  { %2489 = vmatpush3.bf16.msra.mxu0 %v2488_v47 }
0x1ede   :  { %v1764_v37 = vpop.f32.mrb[16].mxu1 }
0x1edf   :  { %v1772_v38 = vadd.f32 %v1771_v36, %v1764_v37  ;;  %v2369_v39 = vpop.f32.mrb[17].mxu1 }
0x1ee1   :  { %v1773_v41 = vsel %vm114_vm0, %v1772_v38, 0.0 }
0x1ee2   :  { %1774 = vadd.xlane.f32.xlu0 %v1773_v41 }
0x1f6f   :  { %v1775_v43 = vpop.xlane.xlu0 %1774 }
0x1f70   :  { %v1777_v58 = vmul.f32 0.0625, %v1775_v43 }
0x1f72   :  { %v1778_v28 = vsub.f32 %v1772_v38, %v1777_v58 }
0x1f74   :  { %v1779_v42 = vmul.f32 %v1778_v28, %v1778_v28 }
0x1f76   :  { %v1780_v45 = vsel %vm114_vm0, %v1779_v42, 0.0 }
0x1f77   :  { %1781 = vadd.xlane.f32.xlu0 %v1780_v45 }
0x2004   :  { %v1782_v27 = vpop.xlane.xlu0 %1781 }
0x2005   :  { %v1783_v48 = vmul.f32 0.0625, %v1782_v27 }
0x2007   :  { %v1784_v49 = vadd.f32 1e-05, %v1783_v48 }
0x2009   :  { %2594 = vrsqrt.f32 %v1784_v49 }
0x2013   :  { %v2595_v59 = vpop.eup %2594 }
0x2014   :  { %v1786_v60 = vmul.f32 %v2595_v59, %v1778_v28 }
0x2016   :  { %v1791_v62 = vmul.f32 %v1790_v57, %v1786_v60 }
0x2018   :  { %v1796_v44 = vadd.f32 %v1795_v61, %v1791_v62 }
0x201a   :  { %v1797_v63 = vmax.f32 %v1796_v44, 0.0 }
0x201c   :  { %2375 = vmatmul.mubr.msk.f32.vlgmr.msra.gmra.mrb[20].mxu0 %vm114_vm0, %v1797_v63 }
0x20ef   :  { %v1869_v2 = vpop.f32.mrb[20].mxu0 }
0x20f0   :  { %v1873_v50 = vadd.f32 %v1869_v2, %v2781_v55  ;;  %v2376_v4 = vpop.f32.mrb[21].mxu0  ;;  %v1904_v55 = vld [vmem:[%s3073_s2 + $0x118] sm:$0xff] }
0x20f1   :  { %v2491_v56 = vpack.c.bf16 %v1904_v55, %v1903_v12 }
0x20f2   :  { %v1878_v26 = vadd.f32 %v1877_v1, %v1873_v50 }
0x20f3   :  { %2492 = vmatpush3.bf16.msra.mxu1 %v2491_v56 }
0x20f4   :  { %v1879_v5 = vsel %vm114_vm0, %v1878_v26, 0.0 }
0x20f5   :  { %1880 = vadd.xlane.f32.xlu1 %v1879_v5 }
0x2182   :  { %v1881_v6 = vpop.xlane.xlu1 %1880 }
0x2183   :  { %v1882_v7 = vmul.f32 0.0625, %v1881_v6 }
0x2185   :  { %v1883_v8 = vsub.f32 %v1878_v26, %v1882_v7 }
0x2187   :  { %v1884_v9 = vmul.f32 %v1883_v8, %v1883_v8 }
0x2189   :  { %v1885_v11 = vsel %vm114_vm0, %v1884_v9, 0.0 }
0x218a   :  { %1886 = vadd.xlane.f32.xlu0 %v1885_v11 }
0x2217   :  { %v1887_v13 = vpop.xlane.xlu0 %1886 }
0x2218   :  { %v1888_v15 = vmul.f32 0.0625, %v1887_v13 }
0x221a   :  { %v1889_v16 = vadd.f32 1e-05, %v1888_v15 }
0x221c   :  { %2596 = vrsqrt.f32 %v1889_v16 }
0x2226   :  { %v2597_v19 = vpop.eup %2596 }
0x2227   :  { %v1891_v21 = vmul.f32 %v2597_v19, %v1883_v8 }
0x2229   :  { %v1896_v22 = vmul.f32 %v1895_v18, %v1891_v21 }
0x222b   :  { %v1901_v23 = vadd.f32 %v1900_v20, %v1896_v22 }
0x222d   :  { %v1902_v29 = vmax.f32 %v1901_v23, 0.0 }
0x222f   :  { %2382 = vmatmul.mubr.msk.f32.vlgmr.msra.gmra.mrb[18].mxu1 %vm114_vm0, %v1902_v29 }
0x2302   :  { %v1974_v25 = vpop.f32.mrb[18].mxu1 }
0x2303   :  { %v1982_v30 = vadd.f32 %v1981_v40, %v1974_v25  ;;  %v2383_v31 = vpop.f32.mrb[19].mxu1 }
0x2305   :  { %v2053_v32 = vmul.f32 -1.442695, %v1982_v30 }
0x2307   :  { %2598 = vpow2.f32 %v2053_v32 }
0x2311   :  { %v2599_v33 = vpop.eup %2598 }
0x2312   :  { %v1986_v54 = vadd.f32 1.0, %v2599_v33 }
0x2314   :  { %2600 = vrcp.f32 %v1986_v54 }
0x231e   :  { %v2601_v34 = vpop.eup %2600 }
0x231f   :  { %v1989_v3 = vmul.f32 10.0, %v2601_v34 }
0x2321   :  { %1992 = vst.msk [vmem:[%s3075_s3] sm:$0xff] %vm1991_vm15, %v1989_v3 }

</bundles_post_ra>
